<compile_context>
chip_gen: v7x
topology: tpu7x:2x2x1
jax: 0.10.0
libtpu: 0.0.40
codegen_flags: <defaults>
</compile_context>

<pallas_src>
import jax
import jax.numpy as jnp
from jax.experimental import pallas as pl
from jax.experimental.pallas import tpu as pltpu

HIDDEN_SIZE = 128


def _lstm_policy_kernel(x_ref, h0_ref, c0_ref,
                        wih_ref, whh_ref, b_ref,
                        wfc_ref, bfc_ref,
                        y_ref, hn_ref, cn_ref,
                        gx_sc, hh_sc):
    """Whole sequence in one kernel invocation (grid=()); time loop fully unrolled."""
    TB, _I = x_ref.shape                 # (T*Bp, I)   bf16
    T, Bp, A_pad = y_ref.shape           # (T, Bp, 128)
    H = HIDDEN_SIZE

    # ---- Prologue: hoisted input projection (one MXU matmul for all T steps) with
    #      the folded bias added once.  gx_sc[t*Bp:(t+1)*Bp] == x_t @ W_ih^T + b.
    gx_sc[...] = (jnp.dot(x_ref[...], wih_ref[...],
                          preferred_element_type=jnp.float32)
                  + jnp.broadcast_to(b_ref[...], (TB, 4 * H)))

    # Initial state read once; recurrent weight hoisted (loop invariant).
    h = h0_ref[...].astype(jnp.float32)   # (Bp, H) f32, carried in vregs
    c = c0_ref[...].astype(jnp.float32)   # (Bp, H) f32
    whh = whh_ref[...]                    # (H, 4H) bf16

    # TODO(synk): hold W_hh stationary in the MXU across steps via
    # pltpu.matmul_push_rhs / matmul_acc_lhs / matmul_pop to avoid re-pushing the
    # (128, 512) weight every step; kept on the portable jnp.dot path here.
    # TODO(synk): for large T, replace the full unroll with lax.fori_loop(unroll=8)
    # or a T-chunk "arbitrary" grid axis (h/c carried in VMEM scratch) so x/y
    # blocks stay bounded and DMA overlaps the recurrence.
    for t in range(T):
        # Recurrent matmul only: (Bp,128) bf16 @ (128,512) bf16 -> f32, + precomputed gx.
        gates = (jnp.dot(h.astype(jnp.bfloat16), whh,
                         preferred_element_type=jnp.float32)
                 + gx_sc[pl.ds(t * Bp, Bp), :])

        i_g = jax.nn.sigmoid(gates[:, 0 * H:1 * H])
        f_g = jax.nn.sigmoid(gates[:, 1 * H:2 * H])
        g_g = jnp.tanh(gates[:, 2 * H:3 * H])
        o_g = jax.nn.sigmoid(gates[:, 3 * H:4 * H])

        c = f_g * c + i_g * g_g
        h = o_g * jnp.tanh(c)

        hh_sc[pl.ds(t * Bp, Bp), :] = h   # tile-aligned (8,128) unmasked store

    # ---- FC head once, batched over all T*Bp rows, lane-dense (A padded to 128).
    y = (jnp.dot(hh_sc[...].astype(jnp.bfloat16), wfc_ref[...],
                 preferred_element_type=jnp.float32)
         + jnp.broadcast_to(bfc_ref[...], (TB, A_pad)))
    for t in range(T):   # tile-aligned (Bp, A_pad) stores into the 3-D output
        y_ref[t] = y[t * Bp:(t + 1) * Bp, :].astype(y_ref.dtype)

    hn_ref[...] = h.astype(hn_ref.dtype)
    cn_ref[...] = c.astype(cn_ref.dtype)


@jax.jit
def lstm_policy_forward(x, h0, c0, w_ih, w_hh, b_ih, b_hh, w_fc, b_fc):
    """Forward pass of LSTMPolicy.

    x:    (T, B, I)           float32
    h0/c0:(1, B, H)           float32
    w_ih: (4H, I)  w_hh: (4H, H)  b_ih/b_hh: (4H,)   (PyTorch layout, gate order i,f,g,o)
    w_fc: (A, H)   b_fc: (A,)
    returns y (T, B, A), (h_n, c_n) each (1, B, H)
    """
    T, B, I = x.shape
    H = HIDDEN_SIZE
    A = w_fc.shape[0]
    A_pad = max(128, ((A + 127) // 128) * 128)   # lane-dense output width
    Bp = ((B + 7) // 8) * 8                      # sublane-pad batch (f32 tile = 8 rows)

    # ---- Plain-JAX glue: pad batch to a full sublane tile, flatten (T, Bp) -> T*Bp,
    #      transpose weights, fold biases, lane-pad the FC head.  MXU operands bf16.
    if Bp != B:
        x = jnp.pad(x, ((0, 0), (0, Bp - B), (0, 0)))
        h0_p = jnp.pad(h0[0], ((0, Bp - B), (0, 0)))
        c0_p = jnp.pad(c0[0], ((0, Bp - B), (0, 0)))
    else:
        h0_p, c0_p = h0[0], c0[0]
    x_flat = x.reshape(T * Bp, I).astype(jnp.bfloat16)

    wih_t = jnp.transpose(w_ih).astype(jnp.bfloat16)                 # (I, 4H)
    whh_t = jnp.transpose(w_hh).astype(jnp.bfloat16)                 # (H, 4H)
    b = (b_ih + b_hh).reshape(1, 4 * H).astype(jnp.float32)          # folded bias
    wfc_t = jnp.zeros((H, A_pad), jnp.bfloat16).at[:, :A].set(
        jnp.transpose(w_fc).astype(jnp.bfloat16))                    # (H, A_pad)
    bfc = jnp.zeros((1, A_pad), jnp.float32).at[:, :A].set(b_fc.reshape(1, A))

    vmem = lambda: pl.BlockSpec(memory_space=pltpu.MemorySpace.VMEM)

    y_pad, hn_p, cn_p = pl.pallas_call(
        _lstm_policy_kernel,
        out_shape=(
            jax.ShapeDtypeStruct((T, Bp, A_pad), x.dtype),   # lane/sublane-dense y
            jax.ShapeDtypeStruct((Bp, H), x.dtype),          # h_n (padded batch)
            jax.ShapeDtypeStruct((Bp, H), x.dtype),          # c_n (padded batch)
        ),
        in_specs=[vmem() for _ in range(8)],
        out_specs=(vmem(), vmem(), vmem()),
        scratch_shapes=[
            pltpu.VMEM((T * Bp, 4 * H), jnp.float32),   # gx: hoisted input projection
            pltpu.VMEM((T * Bp, H), jnp.float32),       # h history for the FC head
        ],
    )(x_flat, h0_p, c0_p, wih_t, whh_t, b, wfc_t, bfc)

    y = y_pad[:, :B, :A]
    return y, (hn_p[None, :B, :], cn_p[None, :B, :])


def _reference_forward(x, h0, c0, w_ih, w_hh, b_ih, b_hh, w_fc, b_fc):
    """Pure-JAX reference implementing torch.nn.LSTM + Linear semantics (f32)."""
    H = HIDDEN_SIZE

    def step(carry, x_t):
        h, c = carry
        gates = x_t @ w_ih.T + b_ih + h @ w_hh.T + b_hh
        i = jax.nn.sigmoid(gates[:, 0 * H:1 * H])
        f = jax.nn.sigmoid(gates[:, 1 * H:2 * H])
        g = jnp.tanh(gates[:, 2 * H:3 * H])
        o = jax.nn.sigmoid(gates[:, 3 * H:4 * H])
        c = f * c + i * g
        h = o * jnp.tanh(c)
        y = h @ w_fc.T + b_fc
        return (h, c), y

    (h_n, c_n), ys = jax.lax.scan(step, (h0[0], c0[0]), x)
    return ys, (h_n[None], c_n[None])


if __name__ == "__main__":
    # Small, deterministic problem sizes consistent with the module.
    SEQ, BATCH, INPUT, ACTION = 8, 2, 32, 8
    H = HIDDEN_SIZE

    key = jax.random.PRNGKey(0)
    ks = jax.random.split(key, 8)
    scale = 1.0 / jnp.sqrt(H)  # PyTorch default uniform(-1/sqrt(H), 1/sqrt(H))

    w_ih = jax.random.uniform(ks[0], (4 * H, INPUT), jnp.float32, -scale, scale)
    w_hh = jax.random.uniform(ks[1], (4 * H, H), jnp.float32, -scale, scale)
    b_ih = jax.random.uniform(ks[2], (4 * H,), jnp.float32, -scale, scale)
    b_hh = jax.random.uniform(ks[3], (4 * H,), jnp.float32, -scale, scale)
    w_fc = jax.random.uniform(ks[4], (ACTION, H), jnp.float32, -scale, scale)
    b_fc = jax.random.uniform(ks[5], (ACTION,), jnp.float32, -scale, scale)

    x = jax.random.normal(ks[6], (SEQ, BATCH, INPUT), jnp.float32)
    # init_hidden(): zeros, as in the PyTorch module.
    h0 = jnp.zeros((1, BATCH, H), jnp.float32)
    c0 = jnp.zeros((1, BATCH, H), jnp.float32)

    y, (h_n, c_n) = lstm_policy_forward(x, h0, c0, w_ih, w_hh, b_ih, b_hh, w_fc, b_fc)
    jax.block_until_ready((y, h_n, c_n))

    y_ref, (h_ref, c_ref) = _reference_forward(x, h0, c0, w_ih, w_hh, b_ih, b_hh, w_fc, b_fc)
    assert y.shape == (SEQ, BATCH, ACTION)
    assert h_n.shape == (1, BATCH, H) and c_n.shape == (1, BATCH, H)
    # Tolerances relaxed for bf16 MXU operands (f32 accumulation / f32 state).
    assert jnp.allclose(y, y_ref, atol=5e-2, rtol=5e-2)
    assert jnp.allclose(h_n, h_ref, atol=5e-2, rtol=5e-2)
    assert jnp.allclose(c_n, c_ref, atol=5e-2, rtol=5e-2)

    print("KERNEL_OK")
</pallas_src>

<mosaic_0001>
module attributes {stable_mosaic.version = 11 : i64} {
  func.func @_lstm_policy_kernel(%arg0: memref<64x32xbf16, #tpu.memory_space<vmem>>, %arg1: memref<8x128xf32, #tpu.memory_space<vmem>>, %arg2: memref<8x128xf32, #tpu.memory_space<vmem>>, %arg3: memref<32x512xbf16, #tpu.memory_space<vmem>>, %arg4: memref<128x512xbf16, #tpu.memory_space<vmem>>, %arg5: memref<1x512xf32, #tpu.memory_space<vmem>>, %arg6: memref<128x128xbf16, #tpu.memory_space<vmem>>, %arg7: memref<1x128xf32, #tpu.memory_space<vmem>>, %arg8: memref<8x8x128xf32, #tpu.memory_space<vmem>>, %arg9: memref<8x128xf32, #tpu.memory_space<vmem>>, %arg10: memref<8x128xf32, #tpu.memory_space<vmem>>, %arg11: memref<64x512xf32, #tpu.memory_space<vmem>>, %arg12: memref<64x128xf32, #tpu.memory_space<vmem>>) attributes {dimension_semantics = [], scalar_prefetch = 0 : i64, scratch_operands = 2 : i64, tpu.core_type = #tpu.core_type<tc>} {
    %c0 = arith.constant 0 : index
    %c0_0 = arith.constant 0 : index
    %0 = vector.load %arg0[%c0, %c0_0] : memref<64x32xbf16, #tpu.memory_space<vmem>>, vector<64x32xbf16>
    %c0_1 = arith.constant 0 : index
    %c0_2 = arith.constant 0 : index
    %1 = vector.load %arg3[%c0_1, %c0_2] : memref<32x512xbf16, #tpu.memory_space<vmem>>, vector<32x512xbf16>
    %cst = arith.constant dense<0.000000e+00> : vector<64x512xf32>
    %2 = tpu.matmul %0, %1, %cst {dimension_numbers = #tpu.dot_dimension_numbers<[1], [0], [0], [1], [0, 0, 1, 1], [], []>} : vector<64x32xbf16>, vector<32x512xbf16>, vector<64x512xf32> -> vector<64x512xf32>
    %c0_3 = arith.constant 0 : index
    %c0_4 = arith.constant 0 : index
    %3 = vector.load %arg5[%c0_3, %c0_4] : memref<1x512xf32, #tpu.memory_space<vmem>>, vector<1x512xf32>
    %4 = vector.shape_cast %3 : vector<1x512xf32> to vector<1x512xf32>
    %5 = vector.broadcast %4 : vector<1x512xf32> to vector<64x512xf32>
    %6 = arith.addf %2, %5 : vector<64x512xf32>
    %c0_5 = arith.constant 0 : index
    %c0_6 = arith.constant 0 : index
    %7 = vector.load %arg11[%c0_5, %c0_6] : memref<64x512xf32, #tpu.memory_space<vmem>>, vector<64x512xf32>
    tpu.vector_store %arg11[%c0_5, %c0_6], %6 {strides = array<i32>} : memref<64x512xf32, #tpu.memory_space<vmem>>, vector<64x512xf32>,
    %c0_7 = arith.constant 0 : index
    %c0_8 = arith.constant 0 : index
    %8 = vector.load %arg1[%c0_7, %c0_8] : memref<8x128xf32, #tpu.memory_space<vmem>>, vector<8x128xf32>
    %c0_9 = arith.constant 0 : index
    %c0_10 = arith.constant 0 : index
    %9 = vector.load %arg2[%c0_9, %c0_10] : memref<8x128xf32, #tpu.memory_space<vmem>>, vector<8x128xf32>
    %c0_11 = arith.constant 0 : index
    %c0_12 = arith.constant 0 : index
    %10 = vector.load %arg4[%c0_11, %c0_12] : memref<128x512xbf16, #tpu.memory_space<vmem>>, vector<128x512xbf16>
    %11 = arith.truncf %8 : vector<8x128xf32> to vector<8x128xbf16>
    %cst_13 = arith.constant dense<0.000000e+00> : vector<8x512xf32>
    %12 = tpu.matmul %11, %10, %cst_13 {dimension_numbers = #tpu.dot_dimension_numbers<[1], [0], [0], [1], [0, 0, 1, 1], [], []>} : vector<8x128xbf16>, vector<128x512xbf16>, vector<8x512xf32> -> vector<8x512xf32>
    %c0_14 = arith.constant 0 : index
    %c0_15 = arith.constant 0 : index
    %13 = vector.load %arg11[%c0_14, %c0_15] : memref<64x512xf32, #tpu.memory_space<vmem>>, vector<8x512xf32>
    %14 = arith.addf %12, %13 : vector<8x512xf32>
    %15 = vector.extract_strided_slice %14 {offsets = [0, 0], sizes = [8, 128], strides = [1, 1]} : vector<8x512xf32> to vector<8x128xf32>
    %16 = arith.negf %15 : vector<8x128xf32>
    %17 = math.exp %16 : vector<8x128xf32>
    %cst_16 = arith.constant 1.000000e+00 : f32
    %18 = vector.broadcast %cst_16 : f32 to vector<8x128xf32>
    %19 = arith.addf %18, %17 : vector<8x128xf32>
    %20 = arith.divf %18, %19 : vector<8x128xf32>
    %21 = vector.extract_strided_slice %14 {offsets = [0, 128], sizes = [8, 128], strides = [1, 1]} : vector<8x512xf32> to vector<8x128xf32>
    %22 = arith.negf %21 : vector<8x128xf32>
    %23 = math.exp %22 : vector<8x128xf32>
    %cst_17 = arith.constant 1.000000e+00 : f32
    %24 = vector.broadcast %cst_17 : f32 to vector<8x128xf32>
    %25 = arith.addf %24, %23 : vector<8x128xf32>
    %26 = arith.divf %24, %25 : vector<8x128xf32>
    %27 = vector.extract_strided_slice %14 {offsets = [0, 256], sizes = [8, 128], strides = [1, 1]} : vector<8x512xf32> to vector<8x128xf32>
    %28 = math.tanh %27 : vector<8x128xf32>
    %29 = vector.extract_strided_slice %14 {offsets = [0, 384], sizes = [8, 128], strides = [1, 1]} : vector<8x512xf32> to vector<8x128xf32>
    %30 = arith.negf %29 : vector<8x128xf32>
    %31 = math.exp %30 : vector<8x128xf32>
    %cst_18 = arith.constant 1.000000e+00 : f32
    %32 = vector.broadcast %cst_18 : f32 to vector<8x128xf32>
    %33 = arith.addf %32, %31 : vector<8x128xf32>
    %34 = arith.divf %32, %33 : vector<8x128xf32>
    %35 = arith.mulf %26, %9 : vector<8x128xf32>
    %36 = arith.mulf %20, %28 : vector<8x128xf32>
    %37 = arith.addf %35, %36 : vector<8x128xf32>
    %38 = math.tanh %37 : vector<8x128xf32>
    %39 = arith.mulf %34, %38 : vector<8x128xf32>
    %c0_19 = arith.constant 0 : index
    %c0_20 = arith.constant 0 : index
    %40 = vector.load %arg12[%c0_19, %c0_20] : memref<64x128xf32, #tpu.memory_space<vmem>>, vector<8x128xf32>
    tpu.vector_store %arg12[%c0_19, %c0_20], %39 {strides = array<i32>} : memref<64x128xf32, #tpu.memory_space<vmem>>, vector<8x128xf32>,
    %41 = arith.truncf %39 : vector<8x128xf32> to vector<8x128xbf16>
    %cst_21 = arith.constant dense<0.000000e+00> : vector<8x512xf32>
    %42 = tpu.matmul %41, %10, %cst_21 {dimension_numbers = #tpu.dot_dimension_numbers<[1], [0], [0], [1], [0, 0, 1, 1], [], []>} : vector<8x128xbf16>, vector<128x512xbf16>, vector<8x512xf32> -> vector<8x512xf32>
    %c8 = arith.constant 8 : index
    %c0_22 = arith.constant 0 : index
    %43 = vector.load %arg11[%c8, %c0_22] : memref<64x512xf32, #tpu.memory_space<vmem>>, vector<8x512xf32>
    %44 = arith.addf %42, %43 : vector<8x512xf32>
    %45 = vector.extract_strided_slice %44 {offsets = [0, 0], sizes = [8, 128], strides = [1, 1]} : vector<8x512xf32> to vector<8x128xf32>
    %46 = arith.negf %45 : vector<8x128xf32>
    %47 = math.exp %46 : vector<8x128xf32>
    %cst_23 = arith.constant 1.000000e+00 : f32
    %48 = vector.broadcast %cst_23 : f32 to vector<8x128xf32>
    %49 = arith.addf %48, %47 : vector<8x128xf32>
    %50 = arith.divf %48, %49 : vector<8x128xf32>
    %51 = vector.extract_strided_slice %44 {offsets = [0, 128], sizes = [8, 128], strides = [1, 1]} : vector<8x512xf32> to vector<8x128xf32>
    %52 = arith.negf %51 : vector<8x128xf32>
    %53 = math.exp %52 : vector<8x128xf32>
    %cst_24 = arith.constant 1.000000e+00 : f32
    %54 = vector.broadcast %cst_24 : f32 to vector<8x128xf32>
    %55 = arith.addf %54, %53 : vector<8x128xf32>
    %56 = arith.divf %54, %55 : vector<8x128xf32>
    %57 = vector.extract_strided_slice %44 {offsets = [0, 256], sizes = [8, 128], strides = [1, 1]} : vector<8x512xf32> to vector<8x128xf32>
    %58 = math.tanh %57 : vector<8x128xf32>
    %59 = vector.extract_strided_slice %44 {offsets = [0, 384], sizes = [8, 128], strides = [1, 1]} : vector<8x512xf32> to vector<8x128xf32>
    %60 = arith.negf %59 : vector<8x128xf32>
    %61 = math.exp %60 : vector<8x128xf32>
    %cst_25 = arith.constant 1.000000e+00 : f32
    %62 = vector.broadcast %cst_25 : f32 to vector<8x128xf32>
    %63 = arith.addf %62, %61 : vector<8x128xf32>
    %64 = arith.divf %62, %63 : vector<8x128xf32>
    %65 = arith.mulf %56, %37 : vector<8x128xf32>
    %66 = arith.mulf %50, %58 : vector<8x128xf32>
    %67 = arith.addf %65, %66 : vector<8x128xf32>
    %68 = math.tanh %67 : vector<8x128xf32>
    %69 = arith.mulf %64, %68 : vector<8x128xf32>
    %c8_26 = arith.constant 8 : index
    %c0_27 = arith.constant 0 : index
    %70 = vector.load %arg12[%c8_26, %c0_27] : memref<64x128xf32, #tpu.memory_space<vmem>>, vector<8x128xf32>
    tpu.vector_store %arg12[%c8_26, %c0_27], %69 {strides = array<i32>} : memref<64x128xf32, #tpu.memory_space<vmem>>, vector<8x128xf32>,
    %71 = arith.truncf %69 : vector<8x128xf32> to vector<8x128xbf16>
    %cst_28 = arith.constant dense<0.000000e+00> : vector<8x512xf32>
    %72 = tpu.matmul %71, %10, %cst_28 {dimension_numbers = #tpu.dot_dimension_numbers<[1], [0], [0], [1], [0, 0, 1, 1], [], []>} : vector<8x128xbf16>, vector<128x512xbf16>, vector<8x512xf32> -> vector<8x512xf32>
    %c16 = arith.constant 16 : index
    %c0_29 = arith.constant 0 : index
    %73 = vector.load %arg11[%c16, %c0_29] : memref<64x512xf32, #tpu.memory_space<vmem>>, vector<8x512xf32>
    %74 = arith.addf %72, %73 : vector<8x512xf32>
    %75 = vector.extract_strided_slice %74 {offsets = [0, 0], sizes = [8, 128], strides = [1, 1]} : vector<8x512xf32> to vector<8x128xf32>
    %76 = arith.negf %75 : vector<8x128xf32>
    %77 = math.exp %76 : vector<8x128xf32>
    %cst_30 = arith.constant 1.000000e+00 : f32
    %78 = vector.broadcast %cst_30 : f32 to vector<8x128xf32>
    %79 = arith.addf %78, %77 : vector<8x128xf32>
    %80 = arith.divf %78, %79 : vector<8x128xf32>
    %81 = vector.extract_strided_slice %74 {offsets = [0, 128], sizes = [8, 128], strides = [1, 1]} : vector<8x512xf32> to vector<8x128xf32>
    %82 = arith.negf %81 : vector<8x128xf32>
    %83 = math.exp %82 : vector<8x128xf32>
    %cst_31 = arith.constant 1.000000e+00 : f32
    %84 = vector.broadcast %cst_31 : f32 to vector<8x128xf32>
    %85 = arith.addf %84, %83 : vector<8x128xf32>
    %86 = arith.divf %84, %85 : vector<8x128xf32>
    %87 = vector.extract_strided_slice %74 {offsets = [0, 256], sizes = [8, 128], strides = [1, 1]} : vector<8x512xf32> to vector<8x128xf32>
    %88 = math.tanh %87 : vector<8x128xf32>
    %89 = vector.extract_strided_slice %74 {offsets = [0, 384], sizes = [8, 128], strides = [1, 1]} : vector<8x512xf32> to vector<8x128xf32>
    %90 = arith.negf %89 : vector<8x128xf32>
    %91 = math.exp %90 : vector<8x128xf32>
    %cst_32 = arith.constant 1.000000e+00 : f32
    %92 = vector.broadcast %cst_32 : f32 to vector<8x128xf32>
    %93 = arith.addf %92, %91 : vector<8x128xf32>
    %94 = arith.divf %92, %93 : vector<8x128xf32>
    %95 = arith.mulf %86, %67 : vector<8x128xf32>
    %96 = arith.mulf %80, %88 : vector<8x128xf32>
    %97 = arith.addf %95, %96 : vector<8x128xf32>
    %98 = math.tanh %97 : vector<8x128xf32>
    %99 = arith.mulf %94, %98 : vector<8x128xf32>
    %c16_33 = arith.constant 16 : index
    %c0_34 = arith.constant 0 : index
    %100 = vector.load %arg12[%c16_33, %c0_34] : memref<64x128xf32, #tpu.memory_space<vmem>>, vector<8x128xf32>
    tpu.vector_store %arg12[%c16_33, %c0_34], %99 {strides = array<i32>} : memref<64x128xf32, #tpu.memory_space<vmem>>, vector<8x128xf32>,
    %101 = arith.truncf %99 : vector<8x128xf32> to vector<8x128xbf16>
    %cst_35 = arith.constant dense<0.000000e+00> : vector<8x512xf32>
    %102 = tpu.matmul %101, %10, %cst_35 {dimension_numbers = #tpu.dot_dimension_numbers<[1], [0], [0], [1], [0, 0, 1, 1], [], []>} : vector<8x128xbf16>, vector<128x512xbf16>, vector<8x512xf32> -> vector<8x512xf32>
    %c24 = arith.constant 24 : index
    %c0_36 = arith.constant 0 : index
    %103 = vector.load %arg11[%c24, %c0_36] : memref<64x512xf32, #tpu.memory_space<vmem>>, vector<8x512xf32>
    %104 = arith.addf %102, %103 : vector<8x512xf32>
    %105 = vector.extract_strided_slice %104 {offsets = [0, 0], sizes = [8, 128], strides = [1, 1]} : vector<8x512xf32> to vector<8x128xf32>
    %106 = arith.negf %105 : vector<8x128xf32>
    %107 = math.exp %106 : vector<8x128xf32>
    %cst_37 = arith.constant 1.000000e+00 : f32
    %108 = vector.broadcast %cst_37 : f32 to vector<8x128xf32>
    %109 = arith.addf %108, %107 : vector<8x128xf32>
    %110 = arith.divf %108, %109 : vector<8x128xf32>
    %111 = vector.extract_strided_slice %104 {offsets = [0, 128], sizes = [8, 128], strides = [1, 1]} : vector<8x512xf32> to vector<8x128xf32>
    %112 = arith.negf %111 : vector<8x128xf32>
    %113 = math.exp %112 : vector<8x128xf32>
    %cst_38 = arith.constant 1.000000e+00 : f32
    %114 = vector.broadcast %cst_38 : f32 to vector<8x128xf32>
    %115 = arith.addf %114, %113 : vector<8x128xf32>
    %116 = arith.divf %114, %115 : vector<8x128xf32>
    %117 = vector.extract_strided_slice %104 {offsets = [0, 256], sizes = [8, 128], strides = [1, 1]} : vector<8x512xf32> to vector<8x128xf32>
    %118 = math.tanh %117 : vector<8x128xf32>
    %119 = vector.extract_strided_slice %104 {offsets = [0, 384], sizes = [8, 128], strides = [1, 1]} : vector<8x512xf32> to vector<8x128xf32>
    %120 = arith.negf %119 : vector<8x128xf32>
    %121 = math.exp %120 : vector<8x128xf32>
    %cst_39 = arith.constant 1.000000e+00 : f32
    %122 = vector.broadcast %cst_39 : f32 to vector<8x128xf32>
    %123 = arith.addf %122, %121 : vector<8x128xf32>
    %124 = arith.divf %122, %123 : vector<8x128xf32>
    %125 = arith.mulf %116, %97 : vector<8x128xf32>
    %126 = arith.mulf %110, %118 : vector<8x128xf32>
    %127 = arith.addf %125, %126 : vector<8x128xf32>
    %128 = math.tanh %127 : vector<8x128xf32>
    %129 = arith.mulf %124, %128 : vector<8x128xf32>
    %c24_40 = arith.constant 24 : index
    %c0_41 = arith.constant 0 : index
    %130 = vector.load %arg12[%c24_40, %c0_41] : memref<64x128xf32, #tpu.memory_space<vmem>>, vector<8x128xf32>
    tpu.vector_store %arg12[%c24_40, %c0_41], %129 {strides = array<i32>} : memref<64x128xf32, #tpu.memory_space<vmem>>, vector<8x128xf32>,
    %131 = arith.truncf %129 : vector<8x128xf32> to vector<8x128xbf16>
    %cst_42 = arith.constant dense<0.000000e+00> : vector<8x512xf32>
    %132 = tpu.matmul %131, %10, %cst_42 {dimension_numbers = #tpu.dot_dimension_numbers<[1], [0], [0], [1], [0, 0, 1, 1], [], []>} : vector<8x128xbf16>, vector<128x512xbf16>, vector<8x512xf32> -> vector<8x512xf32>
    %c32 = arith.constant 32 : index
    %c0_43 = arith.constant 0 : index
    %133 = vector.load %arg11[%c32, %c0_43] : memref<64x512xf32, #tpu.memory_space<vmem>>, vector<8x512xf32>
    %134 = arith.addf %132, %133 : vector<8x512xf32>
    %135 = vector.extract_strided_slice %134 {offsets = [0, 0], sizes = [8, 128], strides = [1, 1]} : vector<8x512xf32> to vector<8x128xf32>
    %136 = arith.negf %135 : vector<8x128xf32>
    %137 = math.exp %136 : vector<8x128xf32>
    %cst_44 = arith.constant 1.000000e+00 : f32
    %138 = vector.broadcast %cst_44 : f32 to vector<8x128xf32>
    %139 = arith.addf %138, %137 : vector<8x128xf32>
    %140 = arith.divf %138, %139 : vector<8x128xf32>
    %141 = vector.extract_strided_slice %134 {offsets = [0, 128], sizes = [8, 128], strides = [1, 1]} : vector<8x512xf32> to vector<8x128xf32>
    %142 = arith.negf %141 : vector<8x128xf32>
    %143 = math.exp %142 : vector<8x128xf32>
    %cst_45 = arith.constant 1.000000e+00 : f32
    %144 = vector.broadcast %cst_45 : f32 to vector<8x128xf32>
    %145 = arith.addf %144, %143 : vector<8x128xf32>
    %146 = arith.divf %144, %145 : vector<8x128xf32>
    %147 = vector.extract_strided_slice %134 {offsets = [0, 256], sizes = [8, 128], strides = [1, 1]} : vector<8x512xf32> to vector<8x128xf32>
    %148 = math.tanh %147 : vector<8x128xf32>
    %149 = vector.extract_strided_slice %134 {offsets = [0, 384], sizes = [8, 128], strides = [1, 1]} : vector<8x512xf32> to vector<8x128xf32>
    %150 = arith.negf %149 : vector<8x128xf32>
    %151 = math.exp %150 : vector<8x128xf32>
    %cst_46 = arith.constant 1.000000e+00 : f32
    %152 = vector.broadcast %cst_46 : f32 to vector<8x128xf32>
    %153 = arith.addf %152, %151 : vector<8x128xf32>
    %154 = arith.divf %152, %153 : vector<8x128xf32>
    %155 = arith.mulf %146, %127 : vector<8x128xf32>
    %156 = arith.mulf %140, %148 : vector<8x128xf32>
    %157 = arith.addf %155, %156 : vector<8x128xf32>
    %158 = math.tanh %157 : vector<8x128xf32>
    %159 = arith.mulf %154, %158 : vector<8x128xf32>
    %c32_47 = arith.constant 32 : index
    %c0_48 = arith.constant 0 : index
    %160 = vector.load %arg12[%c32_47, %c0_48] : memref<64x128xf32, #tpu.memory_space<vmem>>, vector<8x128xf32>
    tpu.vector_store %arg12[%c32_47, %c0_48], %159 {strides = array<i32>} : memref<64x128xf32, #tpu.memory_space<vmem>>, vector<8x128xf32>,
    %161 = arith.truncf %159 : vector<8x128xf32> to vector<8x128xbf16>
    %cst_49 = arith.constant dense<0.000000e+00> : vector<8x512xf32>
    %162 = tpu.matmul %161, %10, %cst_49 {dimension_numbers = #tpu.dot_dimension_numbers<[1], [0], [0], [1], [0, 0, 1, 1], [], []>} : vector<8x128xbf16>, vector<128x512xbf16>, vector<8x512xf32> -> vector<8x512xf32>
    %c40 = arith.constant 40 : index
    %c0_50 = arith.constant 0 : index
    %163 = vector.load %arg11[%c40, %c0_50] : memref<64x512xf32, #tpu.memory_space<vmem>>, vector<8x512xf32>
    %164 = arith.addf %162, %163 : vector<8x512xf32>
    %165 = vector.extract_strided_slice %164 {offsets = [0, 0], sizes = [8, 128], strides = [1, 1]} : vector<8x512xf32> to vector<8x128xf32>
    %166 = arith.negf %165 : vector<8x128xf32>
    %167 = math.exp %166 : vector<8x128xf32>
    %cst_51 = arith.constant 1.000000e+00 : f32
    %168 = vector.broadcast %cst_51 : f32 to vector<8x128xf32>
    %169 = arith.addf %168, %167 : vector<8x128xf32>
    %170 = arith.divf %168, %169 : vector<8x128xf32>
    %171 = vector.extract_strided_slice %164 {offsets = [0, 128], sizes = [8, 128], strides = [1, 1]} : vector<8x512xf32> to vector<8x128xf32>
    %172 = arith.negf %171 : vector<8x128xf32>
    %173 = math.exp %172 : vector<8x128xf32>
    %cst_52 = arith.constant 1.000000e+00 : f32
    %174 = vector.broadcast %cst_52 : f32 to vector<8x128xf32>
    %175 = arith.addf %174, %173 : vector<8x128xf32>
    %176 = arith.divf %174, %175 : vector<8x128xf32>
    %177 = vector.extract_strided_slice %164 {offsets = [0, 256], sizes = [8, 128], strides = [1, 1]} : vector<8x512xf32> to vector<8x128xf32>
    %178 = math.tanh %177 : vector<8x128xf32>
    %179 = vector.extract_strided_slice %164 {offsets = [0, 384], sizes = [8, 128], strides = [1, 1]} : vector<8x512xf32> to vector<8x128xf32>
    %180 = arith.negf %179 : vector<8x128xf32>
    %181 = math.exp %180 : vector<8x128xf32>
    %cst_53 = arith.constant 1.000000e+00 : f32
    %182 = vector.broadcast %cst_53 : f32 to vector<8x128xf32>
    %183 = arith.addf %182, %181 : vector<8x128xf32>
    %184 = arith.divf %182, %183 : vector<8x128xf32>
    %185 = arith.mulf %176, %157 : vector<8x128xf32>
    %186 = arith.mulf %170, %178 : vector<8x128xf32>
    %187 = arith.addf %185, %186 : vector<8x128xf32>
    %188 = math.tanh %187 : vector<8x128xf32>
    %189 = arith.mulf %184, %188 : vector<8x128xf32>
    %c40_54 = arith.constant 40 : index
    %c0_55 = arith.constant 0 : index
    %190 = vector.load %arg12[%c40_54, %c0_55] : memref<64x128xf32, #tpu.memory_space<vmem>>, vector<8x128xf32>
    tpu.vector_store %arg12[%c40_54, %c0_55], %189 {strides = array<i32>} : memref<64x128xf32, #tpu.memory_space<vmem>>, vector<8x128xf32>,
    %191 = arith.truncf %189 : vector<8x128xf32> to vector<8x128xbf16>
    %cst_56 = arith.constant dense<0.000000e+00> : vector<8x512xf32>
    %192 = tpu.matmul %191, %10, %cst_56 {dimension_numbers = #tpu.dot_dimension_numbers<[1], [0], [0], [1], [0, 0, 1, 1], [], []>} : vector<8x128xbf16>, vector<128x512xbf16>, vector<8x512xf32> -> vector<8x512xf32>
    %c48 = arith.constant 48 : index
    %c0_57 = arith.constant 0 : index
    %193 = vector.load %arg11[%c48, %c0_57] : memref<64x512xf32, #tpu.memory_space<vmem>>, vector<8x512xf32>
    %194 = arith.addf %192, %193 : vector<8x512xf32>
    %195 = vector.extract_strided_slice %194 {offsets = [0, 0], sizes = [8, 128], strides = [1, 1]} : vector<8x512xf32> to vector<8x128xf32>
    %196 = arith.negf %195 : vector<8x128xf32>
    %197 = math.exp %196 : vector<8x128xf32>
    %cst_58 = arith.constant 1.000000e+00 : f32
    %198 = vector.broadcast %cst_58 : f32 to vector<8x128xf32>
    %199 = arith.addf %198, %197 : vector<8x128xf32>
    %200 = arith.divf %198, %199 : vector<8x128xf32>
    %201 = vector.extract_strided_slice %194 {offsets = [0, 128], sizes = [8, 128], strides = [1, 1]} : vector<8x512xf32> to vector<8x128xf32>
    %202 = arith.negf %201 : vector<8x128xf32>
    %203 = math.exp %202 : vector<8x128xf32>
    %cst_59 = arith.constant 1.000000e+00 : f32
    %204 = vector.broadcast %cst_59 : f32 to vector<8x128xf32>
    %205 = arith.addf %204, %203 : vector<8x128xf32>
    %206 = arith.divf %204, %205 : vector<8x128xf32>
    %207 = vector.extract_strided_slice %194 {offsets = [0, 256], sizes = [8, 128], strides = [1, 1]} : vector<8x512xf32> to vector<8x128xf32>
    %208 = math.tanh %207 : vector<8x128xf32>
    %209 = vector.extract_strided_slice %194 {offsets = [0, 384], sizes = [8, 128], strides = [1, 1]} : vector<8x512xf32> to vector<8x128xf32>
    %210 = arith.negf %209 : vector<8x128xf32>
    %211 = math.exp %210 : vector<8x128xf32>
    %cst_60 = arith.constant 1.000000e+00 : f32
    %212 = vector.broadcast %cst_60 : f32 to vector<8x128xf32>
    %213 = arith.addf %212, %211 : vector<8x128xf32>
    %214 = arith.divf %212, %213 : vector<8x128xf32>
    %215 = arith.mulf %206, %187 : vector<8x128xf32>
    %216 = arith.mulf %200, %208 : vector<8x128xf32>
    %217 = arith.addf %215, %216 : vector<8x128xf32>
    %218 = math.tanh %217 : vector<8x128xf32>
    %219 = arith.mulf %214, %218 : vector<8x128xf32>
    %c48_61 = arith.constant 48 : index
    %c0_62 = arith.constant 0 : index
    %220 = vector.load %arg12[%c48_61, %c0_62] : memref<64x128xf32, #tpu.memory_space<vmem>>, vector<8x128xf32>
    tpu.vector_store %arg12[%c48_61, %c0_62], %219 {strides = array<i32>} : memref<64x128xf32, #tpu.memory_space<vmem>>, vector<8x128xf32>,
    %221 = arith.truncf %219 : vector<8x128xf32> to vector<8x128xbf16>
    %cst_63 = arith.constant dense<0.000000e+00> : vector<8x512xf32>
    %222 = tpu.matmul %221, %10, %cst_63 {dimension_numbers = #tpu.dot_dimension_numbers<[1], [0], [0], [1], [0, 0, 1, 1], [], []>} : vector<8x128xbf16>, vector<128x512xbf16>, vector<8x512xf32> -> vector<8x512xf32>
    %c56 = arith.constant 56 : index
    %c0_64 = arith.constant 0 : index
    %223 = vector.load %arg11[%c56, %c0_64] : memref<64x512xf32, #tpu.memory_space<vmem>>, vector<8x512xf32>
    %224 = arith.addf %222, %223 : vector<8x512xf32>
    %225 = vector.extract_strided_slice %224 {offsets = [0, 0], sizes = [8, 128], strides = [1, 1]} : vector<8x512xf32> to vector<8x128xf32>
    %226 = arith.negf %225 : vector<8x128xf32>
    %227 = math.exp %226 : vector<8x128xf32>
    %cst_65 = arith.constant 1.000000e+00 : f32
    %228 = vector.broadcast %cst_65 : f32 to vector<8x128xf32>
    %229 = arith.addf %228, %227 : vector<8x128xf32>
    %230 = arith.divf %228, %229 : vector<8x128xf32>
    %231 = vector.extract_strided_slice %224 {offsets = [0, 128], sizes = [8, 128], strides = [1, 1]} : vector<8x512xf32> to vector<8x128xf32>
    %232 = arith.negf %231 : vector<8x128xf32>
    %233 = math.exp %232 : vector<8x128xf32>
    %cst_66 = arith.constant 1.000000e+00 : f32
    %234 = vector.broadcast %cst_66 : f32 to vector<8x128xf32>
    %235 = arith.addf %234, %233 : vector<8x128xf32>
    %236 = arith.divf %234, %235 : vector<8x128xf32>
    %237 = vector.extract_strided_slice %224 {offsets = [0, 256], sizes = [8, 128], strides = [1, 1]} : vector<8x512xf32> to vector<8x128xf32>
    %238 = math.tanh %237 : vector<8x128xf32>
    %239 = vector.extract_strided_slice %224 {offsets = [0, 384], sizes = [8, 128], strides = [1, 1]} : vector<8x512xf32> to vector<8x128xf32>
    %240 = arith.negf %239 : vector<8x128xf32>
    %241 = math.exp %240 : vector<8x128xf32>
    %cst_67 = arith.constant 1.000000e+00 : f32
    %242 = vector.broadcast %cst_67 : f32 to vector<8x128xf32>
    %243 = arith.addf %242, %241 : vector<8x128xf32>
    %244 = arith.divf %242, %243 : vector<8x128xf32>
    %245 = arith.mulf %236, %217 : vector<8x128xf32>
    %246 = arith.mulf %230, %238 : vector<8x128xf32>
    %247 = arith.addf %245, %246 : vector<8x128xf32>
    %248 = math.tanh %247 : vector<8x128xf32>
    %249 = arith.mulf %244, %248 : vector<8x128xf32>
    %c56_68 = arith.constant 56 : index
    %c0_69 = arith.constant 0 : index
    %250 = vector.load %arg12[%c56_68, %c0_69] : memref<64x128xf32, #tpu.memory_space<vmem>>, vector<8x128xf32>
    tpu.vector_store %arg12[%c56_68, %c0_69], %249 {strides = array<i32>} : memref<64x128xf32, #tpu.memory_space<vmem>>, vector<8x128xf32>,
    %c0_70 = arith.constant 0 : index
    %c0_71 = arith.constant 0 : index
    %251 = vector.load %arg12[%c0_70, %c0_71] : memref<64x128xf32, #tpu.memory_space<vmem>>, vector<64x128xf32>
    %252 = arith.truncf %251 : vector<64x128xf32> to vector<64x128xbf16>
    %c0_72 = arith.constant 0 : index
    %c0_73 = arith.constant 0 : index
    %253 = vector.load %arg6[%c0_72, %c0_73] : memref<128x128xbf16, #tpu.memory_space<vmem>>, vector<128x128xbf16>
    %cst_74 = arith.constant dense<0.000000e+00> : vector<64x128xf32>
    %254 = tpu.matmul %252, %253, %cst_74 {dimension_numbers = #tpu.dot_dimension_numbers<[1], [0], [0], [1], [0, 0, 1, 1], [], []>} : vector<64x128xbf16>, vector<128x128xbf16>, vector<64x128xf32> -> vector<64x128xf32>
    %c0_75 = arith.constant 0 : index
    %c0_76 = arith.constant 0 : index
    %255 = vector.load %arg7[%c0_75, %c0_76] : memref<1x128xf32, #tpu.memory_space<vmem>>, vector<1x128xf32>
    %256 = vector.shape_cast %255 : vector<1x128xf32> to vector<1x128xf32>
    %257 = vector.broadcast %256 : vector<1x128xf32> to vector<64x128xf32>
    %258 = arith.addf %254, %257 : vector<64x128xf32>
    %259 = vector.extract_strided_slice %258 {offsets = [0, 0], sizes = [8, 128], strides = [1, 1]} : vector<64x128xf32> to vector<8x128xf32>
    %c0_77 = arith.constant 0 : index
    %c0_78 = arith.constant 0 : index
    %c0_79 = arith.constant 0 : index
    %260 = vector.load %arg8[%c0_77, %c0_78, %c0_79] : memref<8x8x128xf32, #tpu.memory_space<vmem>>, vector<1x8x128xf32>
    %261 = vector.shape_cast %260 : vector<1x8x128xf32> to vector<8x128xf32>
    %262 = vector.shape_cast %259 : vector<8x128xf32> to vector<1x8x128xf32>
    tpu.vector_store %arg8[%c0_77, %c0_78, %c0_79], %262 {strides = array<i32>} : memref<8x8x128xf32, #tpu.memory_space<vmem>>, vector<1x8x128xf32>,
    %263 = vector.extract_strided_slice %258 {offsets = [8, 0], sizes = [8, 128], strides = [1, 1]} : vector<64x128xf32> to vector<8x128xf32>
    %c1 = arith.constant 1 : index
    %c0_80 = arith.constant 0 : index
    %c0_81 = arith.constant 0 : index
    %264 = vector.load %arg8[%c1, %c0_80, %c0_81] : memref<8x8x128xf32, #tpu.memory_space<vmem>>, vector<1x8x128xf32>
    %265 = vector.shape_cast %264 : vector<1x8x128xf32> to vector<8x128xf32>
    %266 = vector.shape_cast %263 : vector<8x128xf32> to vector<1x8x128xf32>
    tpu.vector_store %arg8[%c1, %c0_80, %c0_81], %266 {strides = array<i32>} : memref<8x8x128xf32, #tpu.memory_space<vmem>>, vector<1x8x128xf32>,
    %267 = vector.extract_strided_slice %258 {offsets = [16, 0], sizes = [8, 128], strides = [1, 1]} : vector<64x128xf32> to vector<8x128xf32>
    %c2 = arith.constant 2 : index
    %c0_82 = arith.constant 0 : index
    %c0_83 = arith.constant 0 : index
    %268 = vector.load %arg8[%c2, %c0_82, %c0_83] : memref<8x8x128xf32, #tpu.memory_space<vmem>>, vector<1x8x128xf32>
    %269 = vector.shape_cast %268 : vector<1x8x128xf32> to vector<8x128xf32>
    %270 = vector.shape_cast %267 : vector<8x128xf32> to vector<1x8x128xf32>
    tpu.vector_store %arg8[%c2, %c0_82, %c0_83], %270 {strides = array<i32>} : memref<8x8x128xf32, #tpu.memory_space<vmem>>, vector<1x8x128xf32>,
    %271 = vector.extract_strided_slice %258 {offsets = [24, 0], sizes = [8, 128], strides = [1, 1]} : vector<64x128xf32> to vector<8x128xf32>
    %c3 = arith.constant 3 : index
    %c0_84 = arith.constant 0 : index
    %c0_85 = arith.constant 0 : index
    %272 = vector.load %arg8[%c3, %c0_84, %c0_85] : memref<8x8x128xf32, #tpu.memory_space<vmem>>, vector<1x8x128xf32>
    %273 = vector.shape_cast %272 : vector<1x8x128xf32> to vector<8x128xf32>
    %274 = vector.shape_cast %271 : vector<8x128xf32> to vector<1x8x128xf32>
    tpu.vector_store %arg8[%c3, %c0_84, %c0_85], %274 {strides = array<i32>} : memref<8x8x128xf32, #tpu.memory_space<vmem>>, vector<1x8x128xf32>,
    %275 = vector.extract_strided_slice %258 {offsets = [32, 0], sizes = [8, 128], strides = [1, 1]} : vector<64x128xf32> to vector<8x128xf32>
    %c4 = arith.constant 4 : index
    %c0_86 = arith.constant 0 : index
    %c0_87 = arith.constant 0 : index
    %276 = vector.load %arg8[%c4, %c0_86, %c0_87] : memref<8x8x128xf32, #tpu.memory_space<vmem>>, vector<1x8x128xf32>
    %277 = vector.shape_cast %276 : vector<1x8x128xf32> to vector<8x128xf32>
    %278 = vector.shape_cast %275 : vector<8x128xf32> to vector<1x8x128xf32>
    tpu.vector_store %arg8[%c4, %c0_86, %c0_87], %278 {strides = array<i32>} : memref<8x8x128xf32, #tpu.memory_space<vmem>>, vector<1x8x128xf32>,
    %279 = vector.extract_strided_slice %258 {offsets = [40, 0], sizes = [8, 128], strides = [1, 1]} : vector<64x128xf32> to vector<8x128xf32>
    %c5 = arith.constant 5 : index
    %c0_88 = arith.constant 0 : index
    %c0_89 = arith.constant 0 : index
    %280 = vector.load %arg8[%c5, %c0_88, %c0_89] : memref<8x8x128xf32, #tpu.memory_space<vmem>>, vector<1x8x128xf32>
    %281 = vector.shape_cast %280 : vector<1x8x128xf32> to vector<8x128xf32>
    %282 = vector.shape_cast %279 : vector<8x128xf32> to vector<1x8x128xf32>
    tpu.vector_store %arg8[%c5, %c0_88, %c0_89], %282 {strides = array<i32>} : memref<8x8x128xf32, #tpu.memory_space<vmem>>, vector<1x8x128xf32>,
    %283 = vector.extract_strided_slice %258 {offsets = [48, 0], sizes = [8, 128], strides = [1, 1]} : vector<64x128xf32> to vector<8x128xf32>
    %c6 = arith.constant 6 : index
    %c0_90 = arith.constant 0 : index
    %c0_91 = arith.constant 0 : index
    %284 = vector.load %arg8[%c6, %c0_90, %c0_91] : memref<8x8x128xf32, #tpu.memory_space<vmem>>, vector<1x8x128xf32>
    %285 = vector.shape_cast %284 : vector<1x8x128xf32> to vector<8x128xf32>
    %286 = vector.shape_cast %283 : vector<8x128xf32> to vector<1x8x128xf32>
    tpu.vector_store %arg8[%c6, %c0_90, %c0_91], %286 {strides = array<i32>} : memref<8x8x128xf32, #tpu.memory_space<vmem>>, vector<1x8x128xf32>,
    %287 = vector.extract_strided_slice %258 {offsets = [56, 0], sizes = [8, 128], strides = [1, 1]} : vector<64x128xf32> to vector<8x128xf32>
    %c7 = arith.constant 7 : index
    %c0_92 = arith.constant 0 : index
    %c0_93 = arith.constant 0 : index
    %288 = vector.load %arg8[%c7, %c0_92, %c0_93] : memref<8x8x128xf32, #tpu.memory_space<vmem>>, vector<1x8x128xf32>
    %289 = vector.shape_cast %288 : vector<1x8x128xf32> to vector<8x128xf32>
    %290 = vector.shape_cast %287 : vector<8x128xf32> to vector<1x8x128xf32>
    tpu.vector_store %arg8[%c7, %c0_92, %c0_93], %290 {strides = array<i32>} : memref<8x8x128xf32, #tpu.memory_space<vmem>>, vector<1x8x128xf32>,
    %c0_94 = arith.constant 0 : index
    %c0_95 = arith.constant 0 : index
    %291 = vector.load %arg9[%c0_94, %c0_95] : memref<8x128xf32, #tpu.memory_space<vmem>>, vector<8x128xf32>
    tpu.vector_store %arg9[%c0_94, %c0_95], %249 {strides = array<i32>} : memref<8x128xf32, #tpu.memory_space<vmem>>, vector<8x128xf32>,
    %c0_96 = arith.constant 0 : index
    %c0_97 = arith.constant 0 : index
    %292 = vector.load %arg10[%c0_96, %c0_97] : memref<8x128xf32, #tpu.memory_space<vmem>>, vector<8x128xf32>
    tpu.vector_store %arg10[%c0_96, %c0_97], %247 {strides = array<i32>} : memref<8x128xf32, #tpu.memory_space<vmem>>, vector<8x128xf32>,
    return
  }
}

</mosaic_0001>

<bundles_post_ra>
// kernel: lstm_policy_forward.1
= control target key start
LH: loop header
LB: loop body
LE: loop exit
PB: predicated region body
PF: predicated region fallthrough
CT: control target
= control target key end

     0   :  { %v2826_v1 = vmov 0   ;;  %vm131_vm0 = vcmask 261120   ;;  %v51_v47 = vlaneseq  ;;  %s2815_s3 = inlined_call_operand.vmem [shape: bf16[32,512], index: 3, kind: input, shape index: {}]   ;;  %s2816_s4 = inlined_call_operand.vmem [shape: bf16[128,512], index: 4, kind: input, shape index: {}]   ;;  %s2817_s0 = inlined_call_operand.vmem [shape: bf16[64,32], index: 0, kind: input, shape index: {}]   ;;  %s2818_s1 = inlined_call_operand.vmem [shape: f32[8,128], index: 1, kind: input, shape index: {}]   ;;  %s2819_s5 = inlined_call_operand.vmem [shape: f32[1,512], index: 5, kind: input, shape index: {}]   ;;  %s2820_s2 = inlined_call_operand.vmem [shape: f32[8,128], index: 2, kind: input, shape index: {}]   ;;  %s2821_s6 = inlined_call_operand.vmem [shape: bf16[128,128], index: 6, kind: input, shape index: {}]   ;;  %s2822_s7 = inlined_call_operand.vmem [shape: f32[1,128], index: 7, kind: input, shape index: {}]   ;;  %s2823_s10 = inlined_call_operand.vmem [shape: f32[8,128], index: 10, kind: output, shape index: {2}]   ;;  %s2824_s8 = inlined_call_operand.vmem [shape: f32[8,8,128], index: 8, kind: output, shape index: {0}]   ;;  %s2825_s9 = inlined_call_operand.vmem [shape: f32[8,128], index: 9, kind: output, shape index: {1}]  }
   0x1   :  { %v1718_v0 = vld [vmem:[%s2815_s3 + $0x4] ss:$16 sps:$4 sm:$0xff]   ;;  %176 = vmatprep.mubr.bf16.mxu1 %v2826_v1  ;;  %553 = vmatprep.mubr.bf16.mxu0 %v2826_v1  ;;  %v1722_v3 = vld [vmem:[%s2815_s3] ss:$16 sps:$4 sm:$0xff]   ;;  %v1731_v10 = vld [vmem:[%s2815_s3 + $0x8] ss:$16 sps:$4 sm:$0xff]  }
   0x2   :  { %v2014_v2 = vld [vmem:[%s2816_s4 + $0x4] ss:$16 sps:$4 sm:$0xff]   ;;  %144 = vmatprep.subr.bf16.mxu1 %v1718_v0  ;;  %v2022_v4 = vld [vmem:[%s2816_s4] ss:$16 sps:$4 sm:$0xff]   ;;  %v1733_v11 = vld [vmem:[%s2815_s3 + $0xc] ss:$16 sps:$4 sm:$0xff]  }
   0x3   :  { %521 = vmatprep.subr.bf16.mxu0 %v2014_v2  ;;  %v1724_v5 = vld [vmem:[%s2815_s3 + $0x24] ss:$16 sps:$4 sm:$0xff]   ;;  %145 = vmatpush1.bf16.msra.mxu1 %v1722_v3  ;;  %v1728_v7 = vld [vmem:[%s2815_s3 + $0x20] ss:$16 sps:$4 sm:$0xff]   ;;  %v1740_v17 = vld [vmem:[%s2817_s0 + $0x8] sm:$0xff]   ;;  %v52_v48 = vshrl.u32 %v51_v47, 7 }
   0x4   :  { %522 = vmatpush1.bf16.msra.mxu0 %v2022_v4  ;;  %v2032_v6 = vld [vmem:[%s2816_s4 + $0x24] ss:$16 sps:$4 sm:$0xff]   ;;  %146 = vmatprep.subr.bf16.mxu1 %v1724_v5  ;;  %v2040_v8 = vld [vmem:[%s2816_s4 + $0x20] ss:$16 sps:$4 sm:$0xff]   ;;  %v1750_v19 = vld [vmem:[%s2815_s3 + $0x2c] ss:$16 sps:$4 sm:$0xff]  }
   0x5   :  { %523 = vmatprep.subr.bf16.mxu0 %v2032_v6  ;;  %v1730_v9 = vld [vmem:[%s2817_s0] sm:$0xff]   ;;  %v1748_v21 = vld [vmem:[%s2815_s3 + $0x28] ss:$16 sps:$4 sm:$0xff]   ;;  %v2121_v24 = vld [vmem:[%s2816_s4 + $0xc] ss:$16 sps:$4 sm:$0xff]   ;;  %v53_v49 = vsub.s32 0, %v52_v48 }
   0x6   :  { %v2056_v12 = vld [vmem:[%s2816_s4 + $0x44] ss:$16 sps:$4 sm:$0xff]   ;;  %v2061_v13 = vld [vmem:[%s2816_s4 + $0x40] ss:$16 sps:$4 sm:$0xff]   ;;  %v1757_v30 = vld [vmem:[%s2817_s0 + $0x18] sm:$0xff]   ;;  %v57_v51 = vsub.s32 1, %v52_v48 }
   0x7   :  { %147 = vmatpush1.bf16.msra.mxu1 %v1728_v7  ;;  %v2066_v14 = vld [vmem:[%s2816_s4 + $0x64] ss:$16 sps:$4 sm:$0xff]   ;;  %v2074_v15 = vld [vmem:[%s2816_s4 + $0x60] ss:$16 sps:$4 sm:$0xff]   ;;  %v2164_v32 = vld [vmem:[%s2816_s4 + $0x8] ss:$16 sps:$4 sm:$0xff]  }
   0x8   :  { %524 = vmatpush1.bf16.msra.mxu0 %v2040_v8  ;;  %217 = vmatprep.subr.bf16.mxu1 %v1733_v11  ;;  %v2081_v16 = vld [vmem:[%s2816_s4 + $0x84] ss:$16 sps:$4 sm:$0xff]   ;;  %v2089_v18 = vld [vmem:[%s2816_s4 + $0x80] ss:$16 sps:$4 sm:$0xff]   ;;  %v2170_v33 = vld [vmem:[%s2816_s4 + $0x2c] ss:$16 sps:$4 sm:$0xff]  }
   0x9   :  { %525 = vmatprep.subr.bf16.mxu0 %v2056_v12  ;;  %v2099_v20 = vld [vmem:[%s2816_s4 + $0xa4] ss:$16 sps:$4 sm:$0xff]   ;;  %v2109_v22 = vld [vmem:[%s2816_s4 + $0xa0] ss:$16 sps:$4 sm:$0xff]   ;;  %v2178_v34 = vld [vmem:[%s2816_s4 + $0x28] ss:$16 sps:$4 sm:$0xff]  }
   0xa   :  { %1601 = vmatmul.mubr.msk.bf16.vlgmr.msra.gmra.mrb[0].mxu1 %vm131_vm0, %v1730_v9  ;;  %v2116_v23 = vld [vmem:[%s2816_s4 + $0xc4] ss:$16 sps:$4 sm:$0xff]   ;;  %v2131_v26 = vld [vmem:[%s2816_s4 + $0xc0] ss:$16 sps:$4 sm:$0xff]   ;;  %v2185_v35 = vld [vmem:[%s2816_s4 + $0x4c] ss:$16 sps:$4 sm:$0xff]  }
   0xb   :  { %218 = vmatpush1.bf16.msra.mxu1 %v1731_v10  ;;  %186 = vmatprep.mubr.bf16.mxu1 %v2826_v1  ;;  %v1747_v25 = vld [vmem:[%s2817_s0 + $0x10] sm:$0xff]   ;;  %v322_v29 = vld [vmem:[%s2818_s1] sm:$0xff]  ;;  %v2193_v36 = vld [vmem:[%s2816_s4 + $0x48] ss:$16 sps:$4 sm:$0xff]  }
   0xc   :  { %526 = vmatpush1.bf16.msra.mxu0 %v2061_v13  ;;  %219 = vmatprep.subr.bf16.mxu1 %v1750_v19  ;;  %v2137_v27 = vld [vmem:[%s2816_s4 + $0xe4] ss:$16 sps:$4 sm:$0xff]   ;;  %v2143_v28 = vld [vmem:[%s2816_s4 + $0xe0] ss:$16 sps:$4 sm:$0xff]   ;;  %v356_v31 = vpack.c.bf16 %v322_v29, %v322_v29  ;;  %v2199_v37 = vld [vmem:[%s2816_s4 + $0x6c] ss:$16 sps:$4 sm:$0xff]  }
   0xd   :  { %527 = vmatprep.subr.bf16.mxu0 %v2066_v14  ;;  %v2208_v38 = vld [vmem:[%s2816_s4 + $0x68] ss:$16 sps:$4 sm:$0xff]   ;;  %v2215_v39 = vld [vmem:[%s2816_s4 + $0x8c] ss:$16 sps:$4 sm:$0xff]   ;;  %v49_v50 = vld [vmem:[%s2819_s5] sm:$0xf] }
   0xe   :  { %v2223_v40 = vld [vmem:[%s2816_s4 + $0x88] ss:$16 sps:$4 sm:$0xff]   ;;  %v2229_v41 = vld [vmem:[%s2816_s4 + $0xac] ss:$16 sps:$4 sm:$0xff]   ;;  %v54_v53 = vrot.slane %v49_v50, %v53_v49  ;;  %v58_v55 = vrot.slane %v49_v50, %v57_v51 }
   0xf   :  { %220 = vmatpush1.bf16.msra.mxu1 %v1748_v21  ;;  %v2238_v42 = vld [vmem:[%s2816_s4 + $0xa8] ss:$16 sps:$4 sm:$0xff]   ;;  %v2245_v43 = vld [vmem:[%s2816_s4 + $0xcc] ss:$16 sps:$4 sm:$0xff]  }
  0x10   :  { %528 = vmatpush1.bf16.msra.mxu0 %v2074_v15  ;;  %562 = vmatprep.subr.bf16.mxu1 %v2121_v24  ;;  %v2253_v44 = vld [vmem:[%s2816_s4 + $0xc8] ss:$16 sps:$4 sm:$0xff]   ;;  %v2259_v45 = vld [vmem:[%s2816_s4 + $0xec] ss:$16 sps:$4 sm:$0xff]  }
  0x11   :  { %529 = vmatprep.subr.bf16.mxu0 %v2081_v16  ;;  %v2268_v46 = vld [vmem:[%s2816_s4 + $0xe8] ss:$16 sps:$4 sm:$0xff]  }
  0x12   :  { %1602 = vmatmul.mubr.msk.bf16.gmra.mrb[4].mxu1 %vm131_vm0, %v1740_v17 }
  0x13   :  { %196 = vmatprep.mubr.bf16.mxu1 %v2826_v1 }
  0x14   :  { %530 = vmatpush1.bf16.msra.mxu0 %v2089_v18 }
  0x15   :  { %531 = vmatprep.subr.bf16.mxu0 %v2099_v20 }
  0x18   :  { %532 = vmatpush1.bf16.msra.mxu0 %v2109_v22 }
  0x19   :  { %533 = vmatprep.subr.bf16.mxu0 %v2116_v23 }
  0x1a   :  { %1603 = vmatmul.mubr.msk.bf16.gmra.mrb[8].mxu1 %vm131_vm0, %v1747_v25 }
  0x1b   :  { %206 = vmatprep.mubr.bf16.mxu1 %v2826_v1 }
  0x1c   :  { %534 = vmatpush1.bf16.msra.mxu0 %v2131_v26 }
  0x1d   :  { %535 = vmatprep.subr.bf16.mxu0 %v2137_v27 }
  0x20   :  { %536 = vmatpush1.bf16.msra.mxu0 %v2143_v28 }
  0x21   :  { %633 = vmatprep.subr.bf16.mxu0 %v2014_v2 }
  0x22   :  { %1604 = vmatmul.mubr.msk.bf16.gmra.mrb[12].mxu1 %vm131_vm0, %v1757_v30 }
  0x23   :  { %554 = vmatmul.mubr.bf16.vlgmr.msra.gmra.mrb[0].mxu0 %v356_v31  ;;  %249 = vmatprep.mubr.bf16.mxu1 %v2826_v1 }
  0x24   :  { %634 = vmatpush1.bf16.msra.mxu0 %v2022_v4  ;;  %665 = vmatprep.mubr.bf16.mxu0 %v2826_v1 }
  0x25   :  { %635 = vmatprep.subr.bf16.mxu0 %v2032_v6 }
  0x28   :  { %636 = vmatpush1.bf16.msra.mxu0 %v2040_v8 }
  0x29   :  { %637 = vmatprep.subr.bf16.mxu0 %v2056_v12 }
  0x2a   :  { %1605 = vmatmul.mubr.msk.bf16.vlgmr.msra.gmra.mrb[16].mxu1 %vm131_vm0, %v1730_v9 }
  0x2b   :  { %563 = vmatpush1.bf16.msra.mxu1 %v2164_v32  ;;  %259 = vmatprep.mubr.bf16.mxu1 %v2826_v1 }
  0x2c   :  { %564 = vmatprep.subr.bf16.mxu1 %v2170_v33  ;;  %638 = vmatpush1.bf16.msra.mxu0 %v2061_v13 }
  0x2d   :  { %639 = vmatprep.subr.bf16.mxu0 %v2066_v14 }
  0x2f   :  { %565 = vmatpush1.bf16.msra.mxu1 %v2178_v34 }
  0x30   :  { %566 = vmatprep.subr.bf16.mxu1 %v2185_v35  ;;  %640 = vmatpush1.bf16.msra.mxu0 %v2074_v15 }
  0x31   :  { %641 = vmatprep.subr.bf16.mxu0 %v2081_v16 }
  0x32   :  { %1606 = vmatmul.mubr.msk.bf16.gmra.mrb[20].mxu1 %vm131_vm0, %v1740_v17 }
  0x33   :  { %567 = vmatpush1.bf16.msra.mxu1 %v2193_v36  ;;  %269 = vmatprep.mubr.bf16.mxu1 %v2826_v1 }
  0x34   :  { %568 = vmatprep.subr.bf16.mxu1 %v2199_v37  ;;  %642 = vmatpush1.bf16.msra.mxu0 %v2089_v18 }
  0x35   :  { %643 = vmatprep.subr.bf16.mxu0 %v2099_v20 }
  0x37   :  { %569 = vmatpush1.bf16.msra.mxu1 %v2208_v38 }
  0x38   :  { %570 = vmatprep.subr.bf16.mxu1 %v2215_v39  ;;  %644 = vmatpush1.bf16.msra.mxu0 %v2109_v22 }
  0x39   :  { %645 = vmatprep.subr.bf16.mxu0 %v2116_v23 }
  0x3a   :  { %1607 = vmatmul.mubr.msk.bf16.gmra.mrb[24].mxu1 %vm131_vm0, %v1747_v25 }
  0x3b   :  { %571 = vmatpush1.bf16.msra.mxu1 %v2223_v40  ;;  %279 = vmatprep.mubr.bf16.mxu1 %v2826_v1 }
  0x3c   :  { %572 = vmatprep.subr.bf16.mxu1 %v2229_v41  ;;  %646 = vmatpush1.bf16.msra.mxu0 %v2131_v26 }
  0x3d   :  { %647 = vmatprep.subr.bf16.mxu0 %v2137_v27 }
  0x3f   :  { %573 = vmatpush1.bf16.msra.mxu1 %v2238_v42 }
  0x40   :  { %574 = vmatprep.subr.bf16.mxu1 %v2245_v43  ;;  %648 = vmatpush1.bf16.msra.mxu0 %v2143_v28 }
  0x41   :  { %745 = vmatprep.subr.bf16.mxu0 %v2014_v2 }
  0x42   :  { %1608 = vmatmul.mubr.msk.bf16.gmra.mrb[28].mxu1 %vm131_vm0, %v1757_v30 }
  0x43   :  { %575 = vmatpush1.bf16.msra.mxu1 %v2253_v44  ;;  %594 = vmatprep.mubr.bf16.mxu1 %v2826_v1 }
  0x44   :  { %576 = vmatprep.subr.bf16.mxu1 %v2259_v45 }
  0x47   :  { %577 = vmatpush1.bf16.msra.mxu1 %v2268_v46 }
  0x48   :  { %674 = vmatprep.subr.bf16.mxu1 %v2121_v24 }
  0x4a   :  { %595 = vmatmul.mubr.bf16.vlgmr.msra.gmra.mrb[32].mxu1 %v356_v31 }
  0x4b   :  { %675 = vmatpush1.bf16.msra.mxu1 %v2164_v32  ;;  %706 = vmatprep.mubr.bf16.mxu1 %v2826_v1 }
  0x4c   :  { %676 = vmatprep.subr.bf16.mxu1 %v2170_v33 }
  0x4f   :  { %677 = vmatpush1.bf16.msra.mxu1 %v2178_v34 }
  0x50   :  { %678 = vmatprep.subr.bf16.mxu1 %v2185_v35 }
  0x53   :  { %679 = vmatpush1.bf16.msra.mxu1 %v2193_v36 }
  0x54   :  { %680 = vmatprep.subr.bf16.mxu1 %v2199_v37 }
  0x57   :  { %681 = vmatpush1.bf16.msra.mxu1 %v2208_v38 }
  0x58   :  { %682 = vmatprep.subr.bf16.mxu1 %v2215_v39 }
  0x5b   :  { %683 = vmatpush1.bf16.msra.mxu1 %v2223_v40 }
  0x5c   :  { %684 = vmatprep.subr.bf16.mxu1 %v2229_v41 }
  0x5f   :  { %685 = vmatpush1.bf16.msra.mxu1 %v2238_v42 }
  0x60   :  { %686 = vmatprep.subr.bf16.mxu1 %v2245_v43 }
  0x63   :  { %687 = vmatpush1.bf16.msra.mxu1 %v2253_v44 }
  0x64   :  { %688 = vmatprep.subr.bf16.mxu1 %v2259_v45 }
  0x67   :  { %689 = vmatpush1.bf16.msra.mxu1 %v2268_v46 }
  0x68   :  { %786 = vmatprep.subr.bf16.mxu1 %v2121_v24 }
  0xdd   :  { %v178_v52 = vpop.f32.mrb[0].mxu1 }
  0xde   :  { %v180_v54 = vpop.f32.mrb[1].mxu1  ;;  %v179_v30 = vadd.f32 %v178_v52, %v54_v53  ;;  %v61_v52 = vsub.s32 2, %v52_v48 }
  0xdf   :  { %v182_v56 = vpop.f32.mrb[2].mxu1  ;;  %v181_v31 = vadd.f32 %v180_v54, %v58_v55  ;;  %v65_v54 = vsub.s32 3, %v52_v48 }
  0xe0   :  { %v2294_v57 = vadd.f32 %v182_v56, %v54_v53  ;;  %v184_v58 = vpop.f32.mrb[3].mxu1 }
  0xe1   :  { %v2296_v59 = vadd.f32 %v184_v58, %v58_v55 }
  0xe5   :  { %v188_v60 = vpop.f32.mrb[4].mxu1 }
  0xe6   :  { %v2298_v61 = vadd.f32 %v188_v60, %v54_v53  ;;  %v190_v62 = vpop.f32.mrb[5].mxu1 }
  0xe7   :  { %v2300_v63 = vadd.f32 %v190_v62, %v58_v55  ;;  %v192_v0 = vpop.f32.mrb[6].mxu1 }
  0xe8   :  { %v2302_v3 = vadd.f32 %v192_v0, %v54_v53  ;;  %v194_v5 = vpop.f32.mrb[7].mxu1 }
  0xe9   :  { %v2304_v7 = vadd.f32 %v194_v5, %v58_v55 }
  0xed   :  { %v198_v9 = vpop.f32.mrb[8].mxu1 }
  0xee   :  { %v2306_v10 = vadd.f32 %v198_v9, %v54_v53  ;;  %v200_v11 = vpop.f32.mrb[9].mxu1 }
  0xef   :  { %v2308_v17 = vadd.f32 %v200_v11, %v58_v55  ;;  %v202_v19 = vpop.f32.mrb[10].mxu1 }
  0xf0   :  { %2828 = vst [vmem:[#allocation4_spill] sm:$0xff] %v2306_v10  ;;  %v2310_v21 = vadd.f32 %v202_v19, %v54_v53  ;;  %v204_v25 = vpop.f32.mrb[11].mxu1 }
  0xf1   :  { %2829 = vst [vmem:[#allocation5_spill] sm:$0xff] %v2308_v17  ;;  %v2312_v29 = vadd.f32 %v204_v25, %v58_v55 }
  0xf2   :  { %2830 = vst [vmem:[#allocation6_spill] sm:$0xff] %v2310_v21  ;;  %v62_v21 = vrot.slane %v49_v50, %v61_v52 }
  0xf3   :  { %2831 = vst [vmem:[#allocation7_spill] sm:$0xff] %v2312_v29 }
  0xf5   :  { %v208_v47 = vpop.f32.mrb[12].mxu1 }
  0xf6   :  { %v555_v49 = vpop.f32.mrb[0].mxu0  ;;  %v2314_v51 = vadd.f32 %v208_v47, %v54_v53  ;;  %v210_v58 = vpop.f32.mrb[13].mxu1 }
  0xf7   :  { %v556_v56 = vadd.f32 %v555_v49, %v179_v30  ;;  %v557_v60 = vpop.f32.mrb[1].mxu0  ;;  %v2316_v62 = vadd.f32 %v210_v58, %v58_v55  ;;  %v212_v5 = vpop.f32.mrb[14].mxu1 }
  0xf8   :  { %2832 = vst [vmem:[#allocation8_spill] sm:$0xff] %v2314_v51  ;;  %v558_v0 = vadd.f32 %v557_v60, %v181_v31  ;;  %v559_v9 = vpop.f32.mrb[2].mxu0  ;;  %v2318_v11 = vadd.f32 %v212_v5, %v54_v53  ;;  %v214_v19 = vpop.f32.mrb[15].mxu1  ;;  %v66_v51 = vrot.slane %v49_v50, %v65_v54 }
  0xf9   :  { %2833 = vst [vmem:[#allocation9_spill] sm:$0xff] %v2316_v62  ;;  %v560_v1 = vpop.f32.mrb[3].mxu0  ;;  %v2320_v25 = vadd.f32 %v214_v19, %v58_v55  ;;  %v1641_v50 = vmul.f32 -1.442695, %v556_v56 }
  0xfa   :  { %2834 = vst [vmem:[#allocation10_spill] sm:$0xff] %v2318_v11  ;;  %v1642_v9 = vmul.f32 -1.442695, %v558_v0 }
  0xfb   :  { %2835 = vst [vmem:[#allocation11_spill] sm:$0xff] %v2320_v25 }
  0xfc   :  { %1790 = vpow2.f32 %v1642_v9 }
  0xfd   :  { %v251_v29 = vpop.f32.mrb[16].mxu1  ;;  %1792 = vpow2.f32 %v1641_v50 }
  0xfe   :  { %v253_v47 = vpop.f32.mrb[17].mxu1 }
  0xff   :  { %v255_v30 = vpop.f32.mrb[18].mxu1  ;;  %v254_v10 = vadd.f32 %v253_v47, %v66_v51 }
 0x100   :  { %v2322_v49 = vadd.f32 %v255_v30, %v62_v21  ;;  %v257_v58 = vpop.f32.mrb[19].mxu1 }
 0x101   :  { %v2324_v62 = vadd.f32 %v257_v58, %v66_v51 }
 0x105   :  { %v261_v31 = vpop.f32.mrb[20].mxu1 }
 0x106   :  { %v2326_v60 = vadd.f32 %v261_v31, %v62_v21  ;;  %v263_v53 = vpop.f32.mrb[21].mxu1 }
 0x107   :  { %v2328_v5 = vadd.f32 %v263_v53, %v66_v51  ;;  %v265_v1 = vpop.f32.mrb[22].mxu1 }
 0x108   :  { %v2330_v55 = vadd.f32 %v265_v1, %v62_v21  ;;  %v267_v48 = vpop.f32.mrb[23].mxu1 }
 0x109   :  { %v2332_v19 = vadd.f32 %v267_v48, %v66_v51  ;;  %v1791_v48 = vpop.eup %1790 }
 0x10a   :  { %v1793_v50 = vpop.eup %1792 }
 0x10b   :  { %2836 = vst [vmem:[#allocation12_spill] sm:$0xff] %v2332_v19 }
 0x10d   :  { %v271_v52 = vpop.f32.mrb[24].mxu1 }
 0x10e   :  { %v2334_v54 = vadd.f32 %v271_v52, %v62_v21  ;;  %v273_v30 = vpop.f32.mrb[25].mxu1 }
 0x10f   :  { %v2336_v58 = vadd.f32 %v273_v30, %v66_v51  ;;  %v275_v31 = vpop.f32.mrb[26].mxu1 }
 0x110   :  { %2837 = vst [vmem:[#allocation13_spill] sm:$0xff] %v2334_v54  ;;  %v2338_v25 = vadd.f32 %v275_v31, %v62_v21  ;;  %v277_v53 = vpop.f32.mrb[27].mxu1  ;;  %v606_v31 = vadd.f32 1.0, %v1793_v50 }
 0x111   :  { %2838 = vst [vmem:[#allocation14_spill] sm:$0xff] %v2336_v58  ;;  %v2340_v11 = vadd.f32 %v277_v53, %v66_v51  ;;  %v612_v58 = vadd.f32 1.0, %v1791_v48 }
 0x112   :  { %2839 = vst [vmem:[#allocation15_spill] sm:$0xff] %v2338_v25  ;;  %v252_v25 = vadd.f32 %v251_v29, %v62_v21 }
 0x113   :  { %2840 = vst [vmem:[#allocation16_spill] sm:$0xff] %v2340_v11  ;;  %1794 = vrcp.f32 %v612_v58  ;;  %v2844_v58 = vmov 0  }
 0x114   :  { %1796 = vrcp.f32 %v606_v31 }
 0x115   :  { %v281_v1 = vpop.f32.mrb[28].mxu1 }
 0x116   :  { %v2342_v17 = vadd.f32 %v281_v1, %v62_v21  ;;  %v283_v0 = vpop.f32.mrb[29].mxu1 }
 0x117   :  { %v2344_v56 = vadd.f32 %v283_v0, %v66_v51  ;;  %v285_v9 = vpop.f32.mrb[30].mxu1 }
 0x118   :  { %2841 = vst [vmem:[#allocation17_spill] sm:$0xff] %v2342_v17  ;;  %v2346_v52 = vadd.f32 %v285_v9, %v62_v21  ;;  %v287_v54 = vpop.f32.mrb[31].mxu1 }
 0x119   :  { %2842 = vst [vmem:[#allocation18_spill] sm:$0xff] %v2344_v56  ;;  %v2348_v30 = vadd.f32 %v287_v54, %v66_v51  ;;  %v323_v54 = vld [vmem:[%s2820_s2] sm:$0xff] }
 0x11b   :  { %2843 = vst [vmem:[#allocation19_spill] sm:$0xff] %v2348_v30 }
 0x11d   :  { %v596_v53 = vpop.f32.mrb[32].mxu1  ;;  %v1795_v9 = vpop.eup %1794 }
 0x11e   :  { %v597_v11 = vadd.f32 %v596_v53, %v252_v25  ;;  %v598_v1 = vpop.f32.mrb[33].mxu1  ;;  %v1797_v48 = vpop.eup %1796  ;;  %v622_v21 = vmul.f32 %v1795_v9, %v323_v54 }
 0x11f   :  { %v599_v17 = vadd.f32 %v598_v1, %v254_v10  ;;  %v600_v19 = vpop.f32.mrb[34].mxu1 }
 0x120   :  { %1798 = vtanh.f32 %v597_v11  ;;  %v601_v0 = vpop.f32.mrb[35].mxu1 }
 0x121   :  { %v1643_v56 = vmul.f32 -1.442695, %v599_v17 }
 0x123   :  { %1800 = vpow2.f32 %v1643_v56 }
 0x12a   :  { %v1799_v50 = vpop.eup %1798 }
 0x12b   :  { %v623_v29 = vmul.f32 %v1799_v50, %v1797_v48 }
 0x12d   :  { %v1801_v51 = vpop.eup %1800  ;;  %v2353_v47 = vadd.f32 %v623_v29, %v622_v21 }
 0x12e   :  { %v619_v25 = vadd.f32 1.0, %v1801_v51 }
 0x12f   :  { %1802 = vtanh.f32 %v2353_v47 }
 0x130   :  { %1804 = vrcp.f32 %v619_v25 }
 0x139   :  { %v1803_v10 = vpop.eup %1802 }
 0x13a   :  { %v1805_v11 = vpop.eup %1804 }
 0x13b   :  { %v2356_v17 = vmul.f32 %v1805_v11, %v1803_v10 }
 0x13d   :  { %v628_v19 = vpack.c.bf16 %v2356_v17, %v2356_v17 }
 0x13f   :  { %666 = vmatmul.mubr.bf16.vlgmr.msra.gmra.mrb[4].mxu0 %v628_v19  ;;  %707 = vmatmul.mubr.bf16.vlgmr.msra.gmra.mrb[36].mxu1 %v628_v19 }
 0x140   :  { %746 = vmatpush1.bf16.msra.mxu0 %v2022_v4  ;;  %787 = vmatpush1.bf16.msra.mxu1 %v2164_v32 }
 0x141   :  { %747 = vmatprep.subr.bf16.mxu0 %v2032_v6  ;;  %788 = vmatprep.subr.bf16.mxu1 %v2170_v33 }
 0x142   :  { %777 = vmatprep.mubr.bf16.mxu0 %v2844_v58  ;;  %818 = vmatprep.mubr.bf16.mxu1 %v2844_v58 }
 0x144   :  { %748 = vmatpush1.bf16.msra.mxu0 %v2040_v8  ;;  %789 = vmatpush1.bf16.msra.mxu1 %v2178_v34 }
 0x145   :  { %749 = vmatprep.subr.bf16.mxu0 %v2056_v12  ;;  %790 = vmatprep.subr.bf16.mxu1 %v2185_v35 }
 0x148   :  { %750 = vmatpush1.bf16.msra.mxu0 %v2061_v13  ;;  %791 = vmatpush1.bf16.msra.mxu1 %v2193_v36 }
 0x149   :  { %751 = vmatprep.subr.bf16.mxu0 %v2066_v14  ;;  %792 = vmatprep.subr.bf16.mxu1 %v2199_v37 }
 0x14c   :  { %752 = vmatpush1.bf16.msra.mxu0 %v2074_v15  ;;  %793 = vmatpush1.bf16.msra.mxu1 %v2208_v38 }
 0x14d   :  { %753 = vmatprep.subr.bf16.mxu0 %v2081_v16  ;;  %794 = vmatprep.subr.bf16.mxu1 %v2215_v39 }
 0x150   :  { %754 = vmatpush1.bf16.msra.mxu0 %v2089_v18  ;;  %795 = vmatpush1.bf16.msra.mxu1 %v2223_v40 }
 0x151   :  { %755 = vmatprep.subr.bf16.mxu0 %v2099_v20  ;;  %796 = vmatprep.subr.bf16.mxu1 %v2229_v41 }
 0x154   :  { %756 = vmatpush1.bf16.msra.mxu0 %v2109_v22  ;;  %797 = vmatpush1.bf16.msra.mxu1 %v2238_v42 }
 0x155   :  { %757 = vmatprep.subr.bf16.mxu0 %v2116_v23  ;;  %798 = vmatprep.subr.bf16.mxu1 %v2245_v43 }
 0x158   :  { %758 = vmatpush1.bf16.msra.mxu0 %v2131_v26  ;;  %799 = vmatpush1.bf16.msra.mxu1 %v2253_v44 }
 0x159   :  { %759 = vmatprep.subr.bf16.mxu0 %v2137_v27  ;;  %800 = vmatprep.subr.bf16.mxu1 %v2259_v45 }
 0x15c   :  { %760 = vmatpush1.bf16.msra.mxu0 %v2143_v28  ;;  %801 = vmatpush1.bf16.msra.mxu1 %v2268_v46 }
 0x15d   :  { %857 = vmatprep.subr.bf16.mxu0 %v2014_v2  ;;  %898 = vmatprep.subr.bf16.mxu1 %v2121_v24 }
 0x212   :  { %v667_v56 = vpop.f32.mrb[4].mxu0  ;;  %v708_v31 = vpop.f32.mrb[36].mxu1 }
 0x213   :  { %v668_v53 = vadd.f32 %v667_v56, %v2294_v57  ;;  %v709_v1 = vadd.f32 %v708_v31, %v2322_v49  ;;  %v669_v0 = vpop.f32.mrb[5].mxu0  ;;  %v710_v9 = vpop.f32.mrb[37].mxu1 }
 0x214   :  { %v670_v54 = vadd.f32 %v669_v0, %v2296_v59  ;;  %v711_v48 = vadd.f32 %v710_v9, %v2324_v62  ;;  %v671_v50 = vpop.f32.mrb[6].mxu0  ;;  %v712_v21 = vpop.f32.mrb[38].mxu1 }
 0x215   :  { %v1644_v29 = vmul.f32 -1.442695, %v668_v53  ;;  %v672_v51 = vpop.f32.mrb[7].mxu0  ;;  %v713_v25 = vpop.f32.mrb[39].mxu1 }
 0x216   :  { %v1645_v10 = vmul.f32 -1.442695, %v670_v54  ;;  %v1646_v11 = vmul.f32 -1.442695, %v711_v48 }
 0x217   :  { %1806 = vpow2.f32 %v1644_v29 }
 0x218   :  { %1808 = vpow2.f32 %v1645_v10 }
 0x219   :  { %1810 = vpow2.f32 %v1646_v11 }
 0x21a   :  { %1812 = vtanh.f32 %v709_v1 }
 0x221   :  { %v1807_v19 = vpop.eup %1806 }
 0x222   :  { %v1809_v30 = vpop.eup %1808  ;;  %v718_v57 = vadd.f32 1.0, %v1807_v19 }
 0x223   :  { %v724_v49 = vadd.f32 1.0, %v1809_v30  ;;  %v1811_v59 = vpop.eup %1810 }
 0x224   :  { %1814 = vrcp.f32 %v718_v57  ;;  %v1813_v56 = vpop.eup %1812  ;;  %v731_v53 = vadd.f32 1.0, %v1811_v59 }
 0x225   :  { %1816 = vrcp.f32 %v724_v49 }
 0x226   :  { %1818 = vrcp.f32 %v731_v53 }
 0x22e   :  { %v1815_v62 = vpop.eup %1814 }
 0x22f   :  { %v1817_v31 = vpop.eup %1816  ;;  %v735_v0 = vmul.f32 %v1815_v62, %v1813_v56 }
 0x230   :  { %v734_v9 = vmul.f32 %v1817_v31, %v2353_v47  ;;  %v1819_v48 = vpop.eup %1818 }
 0x232   :  { %v2399_v54 = vadd.f32 %v735_v0, %v734_v9 }
 0x234   :  { %1820 = vtanh.f32 %v2399_v54 }
 0x23e   :  { %v1821_v50 = vpop.eup %1820 }
 0x23f   :  { %v2402_v21 = vmul.f32 %v1821_v50, %v1819_v48 }
 0x241   :  { %v740_v30 = vpack.c.bf16 %v2402_v21, %v2402_v21 }
 0x243   :  { %778 = vmatmul.mubr.bf16.vlgmr.msra.gmra.mrb[8].mxu0 %v740_v30  ;;  %819 = vmatmul.mubr.bf16.vlgmr.msra.gmra.mrb[40].mxu1 %v740_v30 }
 0x244   :  { %858 = vmatpush1.bf16.msra.mxu0 %v2022_v4  ;;  %899 = vmatpush1.bf16.msra.mxu1 %v2164_v32 }
 0x245   :  { %859 = vmatprep.subr.bf16.mxu0 %v2032_v6  ;;  %900 = vmatprep.subr.bf16.mxu1 %v2170_v33 }
 0x246   :  { %889 = vmatprep.mubr.bf16.mxu0 %v2844_v58  ;;  %930 = vmatprep.mubr.bf16.mxu1 %v2844_v58 }
 0x248   :  { %860 = vmatpush1.bf16.msra.mxu0 %v2040_v8  ;;  %901 = vmatpush1.bf16.msra.mxu1 %v2178_v34 }
 0x249   :  { %861 = vmatprep.subr.bf16.mxu0 %v2056_v12  ;;  %902 = vmatprep.subr.bf16.mxu1 %v2185_v35 }
 0x24c   :  { %862 = vmatpush1.bf16.msra.mxu0 %v2061_v13  ;;  %903 = vmatpush1.bf16.msra.mxu1 %v2193_v36 }
 0x24d   :  { %863 = vmatprep.subr.bf16.mxu0 %v2066_v14  ;;  %904 = vmatprep.subr.bf16.mxu1 %v2199_v37 }
 0x250   :  { %864 = vmatpush1.bf16.msra.mxu0 %v2074_v15  ;;  %905 = vmatpush1.bf16.msra.mxu1 %v2208_v38 }
 0x251   :  { %865 = vmatprep.subr.bf16.mxu0 %v2081_v16  ;;  %906 = vmatprep.subr.bf16.mxu1 %v2215_v39 }
 0x254   :  { %866 = vmatpush1.bf16.msra.mxu0 %v2089_v18  ;;  %907 = vmatpush1.bf16.msra.mxu1 %v2223_v40 }
 0x255   :  { %867 = vmatprep.subr.bf16.mxu0 %v2099_v20  ;;  %908 = vmatprep.subr.bf16.mxu1 %v2229_v41 }
 0x258   :  { %868 = vmatpush1.bf16.msra.mxu0 %v2109_v22  ;;  %909 = vmatpush1.bf16.msra.mxu1 %v2238_v42 }
 0x259   :  { %869 = vmatprep.subr.bf16.mxu0 %v2116_v23  ;;  %910 = vmatprep.subr.bf16.mxu1 %v2245_v43 }
 0x25c   :  { %870 = vmatpush1.bf16.msra.mxu0 %v2131_v26  ;;  %911 = vmatpush1.bf16.msra.mxu1 %v2253_v44 }
 0x25d   :  { %871 = vmatprep.subr.bf16.mxu0 %v2137_v27  ;;  %912 = vmatprep.subr.bf16.mxu1 %v2259_v45 }
 0x260   :  { %872 = vmatpush1.bf16.msra.mxu0 %v2143_v28  ;;  %913 = vmatpush1.bf16.msra.mxu1 %v2268_v46 }
 0x261   :  { %969 = vmatprep.subr.bf16.mxu0 %v2014_v2  ;;  %1010 = vmatprep.subr.bf16.mxu1 %v2121_v24 }
 0x316   :  { %v779_v47 = vpop.f32.mrb[8].mxu0  ;;  %v820_v1 = vpop.f32.mrb[40].mxu1 }
 0x317   :  { %v780_v29 = vadd.f32 %v779_v47, %v2298_v61  ;;  %v821_v51 = vadd.f32 %v820_v1, %v2326_v60  ;;  %v781_v25 = vpop.f32.mrb[9].mxu0  ;;  %v822_v10 = vpop.f32.mrb[41].mxu1 }
 0x318   :  { %v782_v11 = vadd.f32 %v781_v25, %v2300_v63  ;;  %v823_v19 = vadd.f32 %v822_v10, %v2328_v5  ;;  %v783_v57 = vpop.f32.mrb[10].mxu0  ;;  %v824_v49 = vpop.f32.mrb[42].mxu1 }
 0x319   :  { %v1647_v59 = vmul.f32 -1.442695, %v780_v29  ;;  %v784_v56 = vpop.f32.mrb[11].mxu0  ;;  %v825_v62 = vpop.f32.mrb[43].mxu1 }
 0x31a   :  { %v1648_v31 = vmul.f32 -1.442695, %v782_v11  ;;  %v1649_v0 = vmul.f32 -1.442695, %v823_v19 }
 0x31b   :  { %1822 = vpow2.f32 %v1647_v59  ;;  %v2845_v59 = vld [vmem:[#allocation12_spill] sm:$0xff] }
 0x31c   :  { %1824 = vpow2.f32 %v1648_v31 }
 0x31d   :  { %1826 = vpow2.f32 %v1649_v0 }
 0x31e   :  { %1828 = vtanh.f32 %v821_v51 }
 0x325   :  { %v1823_v53 = vpop.eup %1822 }
 0x326   :  { %v1825_v9 = vpop.eup %1824  ;;  %v830_v61 = vadd.f32 1.0, %v1823_v53 }
 0x327   :  { %v836_v60 = vadd.f32 1.0, %v1825_v9  ;;  %v1827_v63 = vpop.eup %1826 }
 0x328   :  { %1830 = vrcp.f32 %v830_v61  ;;  %v1829_v48 = vpop.eup %1828  ;;  %v843_v47 = vadd.f32 1.0, %v1827_v63 }
 0x329   :  { %1832 = vrcp.f32 %v836_v60 }
 0x32a   :  { %1834 = vrcp.f32 %v843_v47 }
 0x332   :  { %v1831_v5 = vpop.eup %1830 }
 0x333   :  { %v1833_v50 = vpop.eup %1832  ;;  %v847_v30 = vmul.f32 %v1831_v5, %v1829_v48 }
 0x334   :  { %v846_v1 = vmul.f32 %v1833_v50, %v2399_v54  ;;  %v1835_v25 = vpop.eup %1834 }
 0x336   :  { %v2445_v29 = vadd.f32 %v847_v30, %v846_v1 }
 0x338   :  { %1836 = vtanh.f32 %v2445_v29 }
 0x342   :  { %v1837_v10 = vpop.eup %1836 }
 0x343   :  { %v2448_v11 = vmul.f32 %v1837_v10, %v1835_v25 }
 0x345   :  { %v852_v51 = vpack.c.bf16 %v2448_v11, %v2448_v11 }
 0x347   :  { %890 = vmatmul.mubr.bf16.vlgmr.msra.gmra.mrb[12].mxu0 %v852_v51  ;;  %931 = vmatmul.mubr.bf16.vlgmr.msra.gmra.mrb[44].mxu1 %v852_v51 }
 0x348   :  { %970 = vmatpush1.bf16.msra.mxu0 %v2022_v4  ;;  %1011 = vmatpush1.bf16.msra.mxu1 %v2164_v32 }
 0x349   :  { %971 = vmatprep.subr.bf16.mxu0 %v2032_v6  ;;  %1012 = vmatprep.subr.bf16.mxu1 %v2170_v33 }
 0x34a   :  { %1001 = vmatprep.mubr.bf16.mxu0 %v2844_v58  ;;  %1042 = vmatprep.mubr.bf16.mxu1 %v2844_v58 }
 0x34c   :  { %972 = vmatpush1.bf16.msra.mxu0 %v2040_v8  ;;  %1013 = vmatpush1.bf16.msra.mxu1 %v2178_v34 }
 0x34d   :  { %973 = vmatprep.subr.bf16.mxu0 %v2056_v12  ;;  %1014 = vmatprep.subr.bf16.mxu1 %v2185_v35 }
 0x350   :  { %974 = vmatpush1.bf16.msra.mxu0 %v2061_v13  ;;  %1015 = vmatpush1.bf16.msra.mxu1 %v2193_v36 }
 0x351   :  { %975 = vmatprep.subr.bf16.mxu0 %v2066_v14  ;;  %1016 = vmatprep.subr.bf16.mxu1 %v2199_v37 }
 0x354   :  { %976 = vmatpush1.bf16.msra.mxu0 %v2074_v15  ;;  %1017 = vmatpush1.bf16.msra.mxu1 %v2208_v38 }
 0x355   :  { %977 = vmatprep.subr.bf16.mxu0 %v2081_v16  ;;  %1018 = vmatprep.subr.bf16.mxu1 %v2215_v39 }
 0x358   :  { %978 = vmatpush1.bf16.msra.mxu0 %v2089_v18  ;;  %1019 = vmatpush1.bf16.msra.mxu1 %v2223_v40 }
 0x359   :  { %979 = vmatprep.subr.bf16.mxu0 %v2099_v20  ;;  %1020 = vmatprep.subr.bf16.mxu1 %v2229_v41 }
 0x35c   :  { %980 = vmatpush1.bf16.msra.mxu0 %v2109_v22  ;;  %1021 = vmatpush1.bf16.msra.mxu1 %v2238_v42 }
 0x35d   :  { %981 = vmatprep.subr.bf16.mxu0 %v2116_v23  ;;  %1022 = vmatprep.subr.bf16.mxu1 %v2245_v43 }
 0x360   :  { %982 = vmatpush1.bf16.msra.mxu0 %v2131_v26  ;;  %1023 = vmatpush1.bf16.msra.mxu1 %v2253_v44 }
 0x361   :  { %983 = vmatprep.subr.bf16.mxu0 %v2137_v27  ;;  %1024 = vmatprep.subr.bf16.mxu1 %v2259_v45 }
 0x364   :  { %984 = vmatpush1.bf16.msra.mxu0 %v2143_v28  ;;  %1025 = vmatpush1.bf16.msra.mxu1 %v2268_v46 }
 0x365   :  { %1081 = vmatprep.subr.bf16.mxu0 %v2014_v2  ;;  %1122 = vmatprep.subr.bf16.mxu1 %v2121_v24 }
 0x41a   :  { %v891_v4 = vpop.f32.mrb[12].mxu0  ;;  %v932_v6 = vpop.f32.mrb[44].mxu1 }
 0x41b   :  { %v892_v8 = vadd.f32 %v891_v4, %v2302_v3  ;;  %v933_v54 = vadd.f32 %v932_v6, %v2330_v55  ;;  %v893_v19 = vpop.f32.mrb[13].mxu0  ;;  %v934_v57 = vpop.f32.mrb[45].mxu1 }
 0x41c   :  { %v894_v49 = vadd.f32 %v893_v19, %v2304_v7  ;;  %v935_v56 = vadd.f32 %v934_v57, %v2845_v59  ;;  %v895_v62 = vpop.f32.mrb[14].mxu0  ;;  %v936_v31 = vpop.f32.mrb[46].mxu1 }
 0x41d   :  { %v1650_v0 = vmul.f32 -1.442695, %v892_v8  ;;  %v896_v53 = vpop.f32.mrb[15].mxu0  ;;  %v937_v9 = vpop.f32.mrb[47].mxu1  ;;  %v2501_v8 = vld [vmem:[%s2816_s4] ss:$16 sps:$4 sm:$0xff]  }
 0x41e   :  { %v1651_v2 = vmul.f32 -1.442695, %v894_v49  ;;  %v1652_v61 = vmul.f32 -1.442695, %v935_v56 }
 0x41f   :  { %1838 = vpow2.f32 %v1650_v0 }
 0x420   :  { %1840 = vpow2.f32 %v1651_v2 }
 0x421   :  { %1842 = vpow2.f32 %v1652_v61 }
 0x422   :  { %1844 = vtanh.f32 %v933_v54  ;;  %v2517_v54 = vld [vmem:[%s2816_s4 + $0x20] ss:$16 sps:$4 sm:$0xff]  }
 0x429   :  { %v1839_v60 = vpop.eup %1838 }
 0x42a   :  { %v1841_v63 = vpop.eup %1840  ;;  %v942_v3 = vadd.f32 1.0, %v1839_v60 }
 0x42b   :  { %v948_v55 = vadd.f32 1.0, %v1841_v63  ;;  %v1843_v7 = vpop.eup %1842 }
 0x42c   :  { %1846 = vrcp.f32 %v942_v3  ;;  %v1845_v48 = vpop.eup %1844  ;;  %v955_v47 = vadd.f32 1.0, %v1843_v7 }
 0x42d   :  { %1848 = vrcp.f32 %v948_v55 }
 0x42e   :  { %1850 = vrcp.f32 %v955_v47 }
 0x436   :  { %v1847_v5 = vpop.eup %1846 }
 0x437   :  { %v1849_v50 = vpop.eup %1848  ;;  %v959_v30 = vmul.f32 %v1847_v5, %v1845_v48 }
 0x438   :  { %v958_v1 = vmul.f32 %v1849_v50, %v2445_v29  ;;  %v1851_v10 = vpop.eup %1850  ;;  %v2508_v29 = vld [vmem:[%s2816_s4 + $0x24] ss:$16 sps:$4 sm:$0xff]  }
 0x43a   :  { %v2491_v25 = vadd.f32 %v959_v30, %v958_v1 }
 0x43c   :  { %1852 = vtanh.f32 %v2491_v25 }
 0x446   :  { %v1853_v51 = vpop.eup %1852 }
 0x447   :  { %v2494_v4 = vmul.f32 %v1853_v51, %v1851_v10  ;;  %v2850_v51 = vld [vmem:[#allocation6_spill] sm:$0xff] }
 0x449   :  { %v964_v6 = vpack.c.bf16 %v2494_v4, %v2494_v4 }
 0x44b   :  { %1002 = vmatmul.mubr.bf16.vlgmr.msra.gmra.mrb[16].mxu0 %v964_v6  ;;  %1043 = vmatmul.mubr.bf16.vlgmr.msra.gmra.mrb[48].mxu1 %v964_v6  ;;  %v2851_v6 = vld [vmem:[#allocation15_spill] sm:$0xff] }
 0x44c   :  { %1082 = vmatpush1.bf16.msra.mxu0 %v2501_v8  ;;  %1123 = vmatpush1.bf16.msra.mxu1 %v2164_v32 }
 0x44d   :  { %1083 = vmatprep.subr.bf16.mxu0 %v2508_v29  ;;  %1124 = vmatprep.subr.bf16.mxu1 %v2170_v33 }
 0x44e   :  { %1113 = vmatprep.mubr.bf16.mxu0 %v2844_v58  ;;  %1154 = vmatprep.mubr.bf16.mxu1 %v2844_v58 }
 0x450   :  { %1084 = vmatpush1.bf16.msra.mxu0 %v2517_v54  ;;  %1125 = vmatpush1.bf16.msra.mxu1 %v2178_v34 }
 0x451   :  { %1085 = vmatprep.subr.bf16.mxu0 %v2056_v12  ;;  %1126 = vmatprep.subr.bf16.mxu1 %v2185_v35  ;;  %v2548_v12 = vld [vmem:[%s2816_s4 + $0x4] ss:$16 sps:$4 sm:$0xff]  }
 0x454   :  { %1086 = vmatpush1.bf16.msra.mxu0 %v2061_v13  ;;  %1127 = vmatpush1.bf16.msra.mxu1 %v2193_v36 }
 0x455   :  { %1087 = vmatprep.subr.bf16.mxu0 %v2066_v14  ;;  %1128 = vmatprep.subr.bf16.mxu1 %v2199_v37 }
 0x458   :  { %1088 = vmatpush1.bf16.msra.mxu0 %v2074_v15  ;;  %1129 = vmatpush1.bf16.msra.mxu1 %v2208_v38  ;;  %v2846_v15 = vld [vmem:[#allocation4_spill] sm:$0xff] }
 0x459   :  { %1089 = vmatprep.subr.bf16.mxu0 %v2081_v16  ;;  %1130 = vmatprep.subr.bf16.mxu1 %v2215_v39 }
 0x45c   :  { %1090 = vmatpush1.bf16.msra.mxu0 %v2089_v18  ;;  %1131 = vmatpush1.bf16.msra.mxu1 %v2223_v40  ;;  %v2847_v18 = vld [vmem:[#allocation13_spill] sm:$0xff] }
 0x45d   :  { %1091 = vmatprep.subr.bf16.mxu0 %v2099_v20  ;;  %1132 = vmatprep.subr.bf16.mxu1 %v2229_v41 }
 0x460   :  { %1092 = vmatpush1.bf16.msra.mxu0 %v2109_v22  ;;  %1133 = vmatpush1.bf16.msra.mxu1 %v2238_v42 }
 0x461   :  { %1093 = vmatprep.subr.bf16.mxu0 %v2116_v23  ;;  %1134 = vmatprep.subr.bf16.mxu1 %v2245_v43 }
 0x464   :  { %1094 = vmatpush1.bf16.msra.mxu0 %v2131_v26  ;;  %1135 = vmatpush1.bf16.msra.mxu1 %v2253_v44  ;;  %v2848_v26 = vld [vmem:[#allocation5_spill] sm:$0xff] }
 0x465   :  { %1095 = vmatprep.subr.bf16.mxu0 %v2137_v27  ;;  %1136 = vmatprep.subr.bf16.mxu1 %v2259_v45 }
 0x468   :  { %1096 = vmatpush1.bf16.msra.mxu0 %v2143_v28  ;;  %1137 = vmatpush1.bf16.msra.mxu1 %v2268_v46  ;;  %v2849_v28 = vld [vmem:[#allocation14_spill] sm:$0xff] }
 0x469   :  { %1193 = vmatprep.subr.bf16.mxu0 %v2548_v12  ;;  %1234 = vmatprep.subr.bf16.mxu1 %v2121_v24 }
 0x51e   :  { %v1003_v13 = vpop.f32.mrb[16].mxu0  ;;  %v1044_v14 = vpop.f32.mrb[48].mxu1 }
 0x51f   :  { %v1004_v16 = vadd.f32 %v1003_v13, %v2846_v15  ;;  %v1045_v20 = vadd.f32 %v1044_v14, %v2847_v18  ;;  %v1005_v22 = vpop.f32.mrb[17].mxu0  ;;  %v1046_v23 = vpop.f32.mrb[49].mxu1 }
 0x520   :  { %v1006_v27 = vadd.f32 %v1005_v22, %v2848_v26  ;;  %v1047_v19 = vadd.f32 %v1046_v23, %v2849_v28  ;;  %v1007_v57 = vpop.f32.mrb[18].mxu0  ;;  %v1048_v49 = vpop.f32.mrb[50].mxu1 }
 0x521   :  { %v1653_v59 = vmul.f32 -1.442695, %v1004_v16  ;;  %v1008_v56 = vpop.f32.mrb[19].mxu0  ;;  %v1049_v62 = vpop.f32.mrb[51].mxu1  ;;  %v2852_v16 = vld [vmem:[#allocation7_spill] sm:$0xff] }
 0x522   :  { %v1654_v31 = vmul.f32 -1.442695, %v1006_v27  ;;  %v1655_v24 = vmul.f32 -1.442695, %v1047_v19 }
 0x523   :  { %1854 = vpow2.f32 %v1653_v59 }
 0x524   :  { %1856 = vpow2.f32 %v1654_v31 }
 0x525   :  { %1858 = vpow2.f32 %v1655_v24 }
 0x526   :  { %1860 = vtanh.f32 %v1045_v20  ;;  %v2853_v20 = vld [vmem:[#allocation16_spill] sm:$0xff] }
 0x52d   :  { %v1855_v0 = vpop.eup %1854 }
 0x52e   :  { %v1857_v53 = vpop.eup %1856  ;;  %v1054_v9 = vadd.f32 1.0, %v1855_v0 }
 0x52f   :  { %v1060_v2 = vadd.f32 1.0, %v1857_v53  ;;  %v1859_v61 = vpop.eup %1858 }
 0x530   :  { %1862 = vrcp.f32 %v1054_v9  ;;  %v1861_v60 = vpop.eup %1860  ;;  %v1067_v7 = vadd.f32 1.0, %v1859_v61 }
 0x531   :  { %1864 = vrcp.f32 %v1060_v2 }
 0x532   :  { %1866 = vrcp.f32 %v1067_v7  ;;  %v1935_v7 = vld [vmem:[%s2816_s4 + $0x8] ss:$16 sps:$4 sm:$0xff]  }
 0x53a   :  { %v1863_v63 = vpop.eup %1862 }
 0x53b   :  { %v1865_v3 = vpop.eup %1864  ;;  %v1071_v55 = vmul.f32 %v1863_v63, %v1861_v60 }
 0x53c   :  { %v1070_v48 = vmul.f32 %v1865_v3, %v2491_v25  ;;  %v1867_v50 = vpop.eup %1866  ;;  %v2575_v25 = vld [vmem:[%s2816_s4 + $0x44] ss:$16 sps:$4 sm:$0xff]  }
 0x53e   :  { %v2557_v5 = vadd.f32 %v1071_v55, %v1070_v48  ;;  %v1936_v48 = vld [vmem:[%s2816_s4 + $0x2c] ss:$16 sps:$4 sm:$0xff]  }
 0x540   :  { %1868 = vtanh.f32 %v2557_v5 }
 0x54a   :  { %v1869_v30 = vpop.eup %1868 }
 0x54b   :  { %v2560_v47 = vmul.f32 %v1869_v30, %v1867_v50  ;;  %v1942_v50 = vld [vmem:[%s2816_s4 + $0x8c] ss:$16 sps:$4 sm:$0xff]   ;;  %v1943_v30 = vld [vmem:[%s2816_s4 + $0x88] ss:$16 sps:$4 sm:$0xff]  }
 0x54d   :  { %v1076_v1 = vpack.c.bf16 %v2560_v47, %v2560_v47 }
 0x54f   :  { %1114 = vmatmul.mubr.bf16.vlgmr.msra.gmra.mrb[20].mxu0 %v1076_v1  ;;  %1155 = vmatmul.mubr.bf16.vlgmr.msra.gmra.mrb[52].mxu1 %v1076_v1  ;;  %v1944_v1 = vld [vmem:[%s2816_s4 + $0xac] ss:$16 sps:$4 sm:$0xff]  }
 0x550   :  { %1194 = vmatpush1.bf16.msra.mxu0 %v2501_v8  ;;  %1235 = vmatpush1.bf16.msra.mxu1 %v2164_v32  ;;  %v2582_v32 = vld [vmem:[%s2816_s4 + $0x40] ss:$16 sps:$4 sm:$0xff]  }
 0x551   :  { %1195 = vmatprep.subr.bf16.mxu0 %v2508_v29  ;;  %1236 = vmatprep.subr.bf16.mxu1 %v2170_v33  ;;  %v2589_v33 = vld [vmem:[%s2816_s4 + $0x64] ss:$16 sps:$4 sm:$0xff]  }
 0x552   :  { %1225 = vmatprep.mubr.bf16.mxu0 %v2844_v58  ;;  %1266 = vmatprep.mubr.bf16.mxu1 %v2844_v58 }
 0x554   :  { %1196 = vmatpush1.bf16.msra.mxu0 %v2517_v54  ;;  %1237 = vmatpush1.bf16.msra.mxu1 %v2178_v34  ;;  %v2596_v34 = vld [vmem:[%s2816_s4 + $0x60] ss:$16 sps:$4 sm:$0xff]  }
 0x555   :  { %1197 = vmatprep.subr.bf16.mxu0 %v2575_v25  ;;  %1238 = vmatprep.subr.bf16.mxu1 %v2185_v35  ;;  %v2603_v35 = vld [vmem:[%s2816_s4 + $0x84] ss:$16 sps:$4 sm:$0xff]  }
 0x558   :  { %1198 = vmatpush1.bf16.msra.mxu0 %v2582_v32  ;;  %1239 = vmatpush1.bf16.msra.mxu1 %v2193_v36  ;;  %v2610_v36 = vld [vmem:[%s2816_s4 + $0x80] ss:$16 sps:$4 sm:$0xff]  }
 0x559   :  { %1199 = vmatprep.subr.bf16.mxu0 %v2589_v33  ;;  %1240 = vmatprep.subr.bf16.mxu1 %v2199_v37  ;;  %v2617_v37 = vld [vmem:[%s2816_s4 + $0xa4] ss:$16 sps:$4 sm:$0xff]  }
 0x55c   :  { %1200 = vmatpush1.bf16.msra.mxu0 %v2596_v34  ;;  %1241 = vmatpush1.bf16.msra.mxu1 %v2208_v38  ;;  %v2624_v38 = vld [vmem:[%s2816_s4 + $0xa0] ss:$16 sps:$4 sm:$0xff]  }
 0x55d   :  { %1201 = vmatprep.subr.bf16.mxu0 %v2603_v35  ;;  %1242 = vmatprep.subr.bf16.mxu1 %v2215_v39  ;;  %v2631_v39 = vld [vmem:[%s2816_s4 + $0xc4] ss:$16 sps:$4 sm:$0xff]  }
 0x560   :  { %1202 = vmatpush1.bf16.msra.mxu0 %v2610_v36  ;;  %1243 = vmatpush1.bf16.msra.mxu1 %v2223_v40  ;;  %v2638_v40 = vld [vmem:[%s2816_s4 + $0xc0] ss:$16 sps:$4 sm:$0xff]  }
 0x561   :  { %1203 = vmatprep.subr.bf16.mxu0 %v2617_v37  ;;  %1244 = vmatprep.subr.bf16.mxu1 %v2229_v41  ;;  %v2645_v41 = vld [vmem:[%s2816_s4 + $0xe4] ss:$16 sps:$4 sm:$0xff]  }
 0x564   :  { %1204 = vmatpush1.bf16.msra.mxu0 %v2624_v38  ;;  %1245 = vmatpush1.bf16.msra.mxu1 %v2238_v42  ;;  %v2652_v42 = vld [vmem:[%s2816_s4 + $0xe0] ss:$16 sps:$4 sm:$0xff]  }
 0x565   :  { %1205 = vmatprep.subr.bf16.mxu0 %v2631_v39  ;;  %1246 = vmatprep.subr.bf16.mxu1 %v2245_v43  ;;  %v1934_v43 = vld [vmem:[%s2816_s4 + $0xc] ss:$16 sps:$4 sm:$0xff]  }
 0x568   :  { %1206 = vmatpush1.bf16.msra.mxu0 %v2638_v40  ;;  %1247 = vmatpush1.bf16.msra.mxu1 %v2253_v44 }
 0x569   :  { %1207 = vmatprep.subr.bf16.mxu0 %v2645_v41  ;;  %1248 = vmatprep.subr.bf16.mxu1 %v2259_v45 }
 0x56c   :  { %1208 = vmatpush1.bf16.msra.mxu0 %v2652_v42  ;;  %1249 = vmatpush1.bf16.msra.mxu1 %v2268_v46 }
 0x56d   :  { %1305 = vmatprep.subr.bf16.mxu0 %v2548_v12  ;;  %1346 = vmatprep.subr.bf16.mxu1 %v1934_v43 }
 0x622   :  { %v1115_v44 = vpop.f32.mrb[20].mxu0  ;;  %v1156_v10 = vpop.f32.mrb[52].mxu1 }
 0x623   :  { %v1116_v45 = vadd.f32 %v1115_v44, %v2850_v51  ;;  %v1157_v13 = vadd.f32 %v1156_v10, %v2851_v6  ;;  %v1117_v14 = vpop.f32.mrb[21].mxu0  ;;  %v1158_v15 = vpop.f32.mrb[53].mxu1  ;;  %v2856_v51 = vld [vmem:[#allocation9_spill] sm:$0xff] }
 0x624   :  { %v1118_v18 = vadd.f32 %v1117_v14, %v2852_v16  ;;  %v1159_v22 = vadd.f32 %v1158_v15, %v2853_v20  ;;  %v1119_v46 = vpop.f32.mrb[22].mxu0  ;;  %v1160_v23 = vpop.f32.mrb[54].mxu1 }
 0x625   :  { %v1656_v12 = vmul.f32 -1.442695, %v1116_v45  ;;  %v1120_v26 = vpop.f32.mrb[23].mxu0  ;;  %v1161_v27 = vpop.f32.mrb[55].mxu1  ;;  %v2857_v45 = vld [vmem:[#allocation18_spill] sm:$0xff] }
 0x626   :  { %v1657_v28 = vmul.f32 -1.442695, %v1118_v18  ;;  %v1658_v19 = vmul.f32 -1.442695, %v1159_v22 }
 0x627   :  { %1870 = vpow2.f32 %v1656_v12 }
 0x628   :  { %1872 = vpow2.f32 %v1657_v28 }
 0x629   :  { %1874 = vpow2.f32 %v1658_v19 }
 0x62a   :  { %1876 = vtanh.f32 %v1157_v13 }
 0x631   :  { %v1871_v57 = vpop.eup %1870 }
 0x632   :  { %v1873_v49 = vpop.eup %1872  ;;  %v1166_v59 = vadd.f32 1.0, %v1871_v57 }
 0x633   :  { %v1172_v56 = vadd.f32 1.0, %v1873_v49  ;;  %v1875_v62 = vpop.eup %1874 }
 0x634   :  { %1878 = vrcp.f32 %v1166_v59  ;;  %v1877_v31 = vpop.eup %1876  ;;  %v1179_v9 = vadd.f32 1.0, %v1875_v62 }
 0x635   :  { %1880 = vrcp.f32 %v1172_v56 }
 0x636   :  { %1882 = vrcp.f32 %v1179_v9  ;;  %v1783_v9 = vld [vmem:[%s2821_s6 + $0x8] sm:$0xff]  }
 0x63e   :  { %v1879_v24 = vpop.eup %1878 }
 0x63f   :  { %v1881_v0 = vpop.eup %1880  ;;  %v1183_v53 = vmul.f32 %v1879_v24, %v1877_v31 }
 0x640   :  { %v1182_v2 = vmul.f32 %v1881_v0, %v2557_v5  ;;  %v1883_v60 = vpop.eup %1882  ;;  %v1941_v5 = vld [vmem:[%s2816_s4 + $0x68] ss:$16 sps:$4 sm:$0xff]  }
 0x642   :  { %v2665_v61 = vadd.f32 %v1183_v53, %v1182_v2  ;;  %v1420_v2 = vpack.c.bf16 %v2402_v21, %v2356_v17  ;;  %v1786_v17 = vld [vmem:[%s2821_s6 + $0x20] sm:$0xff]   ;;  %v1787_v21 = vld [vmem:[%s2821_s6 + $0x28] sm:$0xff]  }
 0x644   :  { %1884 = vtanh.f32 %v2665_v61 }
 0x64e   :  { %v1885_v63 = vpop.eup %1884 }
 0x64f   :  { %v2668_v3 = vmul.f32 %v1885_v63, %v1883_v60  ;;  %v1785_v60 = vld [vmem:[%s2821_s6 + $0x18] sm:$0xff]   ;;  %v1788_v63 = vld [vmem:[%s2821_s6 + $0x30] sm:$0xff]  }
 0x651   :  { %v1188_v55 = vpack.c.bf16 %v2668_v3, %v2668_v3 }
 0x653   :  { %1226 = vmatmul.mubr.bf16.vlgmr.msra.gmra.mrb[24].mxu0 %v1188_v55  ;;  %1267 = vmatmul.mubr.bf16.vlgmr.msra.gmra.mrb[56].mxu1 %v1188_v55  ;;  %v1789_v55 = vld [vmem:[%s2821_s6 + $0x38] sm:$0xff]  }
 0x654   :  { %1306 = vmatpush1.bf16.msra.mxu0 %v2501_v8  ;;  %1347 = vmatpush1.bf16.msra.mxu1 %v1935_v7  ;;  %v1937_v8 = vld [vmem:[%s2816_s4 + $0x28] ss:$16 sps:$4 sm:$0xff]   ;;  %v1421_v7 = vpack.c.bf16 %v2494_v4, %v2448_v11 }
 0x655   :  { %1307 = vmatprep.subr.bf16.mxu0 %v2508_v29  ;;  %1348 = vmatprep.subr.bf16.mxu1 %v1936_v48  ;;  %v1938_v29 = vld [vmem:[%s2816_s4 + $0x4c] ss:$16 sps:$4 sm:$0xff]   ;;  %v1422_v48 = vpack.c.bf16 %v2668_v3, %v2560_v47 }
 0x656   :  { %1337 = vmatprep.mubr.bf16.mxu0 %v2844_v58  ;;  %1378 = vmatprep.mubr.bf16.mxu1 %v2844_v58  ;;  %v1939_v58 = vld [vmem:[%s2816_s4 + $0x48] ss:$16 sps:$4 sm:$0xff]  }
 0x658   :  { %1308 = vmatpush1.bf16.msra.mxu0 %v2517_v54  ;;  %1349 = vmatpush1.bf16.msra.mxu1 %v1937_v8  ;;  %v1940_v54 = vld [vmem:[%s2816_s4 + $0x6c] ss:$16 sps:$4 sm:$0xff]  }
 0x659   :  { %1309 = vmatprep.subr.bf16.mxu0 %v2575_v25  ;;  %1350 = vmatprep.subr.bf16.mxu1 %v1938_v29  ;;  %v1945_v25 = vld [vmem:[%s2816_s4 + $0xa8] ss:$16 sps:$4 sm:$0xff]  }
 0x65c   :  { %1310 = vmatpush1.bf16.msra.mxu0 %v2582_v32  ;;  %1351 = vmatpush1.bf16.msra.mxu1 %v1939_v58  ;;  %v1946_v32 = vld [vmem:[%s2816_s4 + $0xcc] ss:$16 sps:$4 sm:$0xff]   ;;  %v2858_v58 = vld [vmem:[#allocation10_spill] sm:$0xff] }
 0x65d   :  { %1311 = vmatprep.subr.bf16.mxu0 %v2589_v33  ;;  %1352 = vmatprep.subr.bf16.mxu1 %v1940_v54  ;;  %v1947_v33 = vld [vmem:[%s2816_s4 + $0xc8] ss:$16 sps:$4 sm:$0xff]  }
 0x660   :  { %1312 = vmatpush1.bf16.msra.mxu0 %v2596_v34  ;;  %1353 = vmatpush1.bf16.msra.mxu1 %v1941_v5  ;;  %v1948_v34 = vld [vmem:[%s2816_s4 + $0xec] ss:$16 sps:$4 sm:$0xff]  }
 0x661   :  { %1313 = vmatprep.subr.bf16.mxu0 %v2603_v35  ;;  %1354 = vmatprep.subr.bf16.mxu1 %v1942_v50  ;;  %v1949_v35 = vld [vmem:[%s2816_s4 + $0xe8] ss:$16 sps:$4 sm:$0xff]  }
 0x664   :  { %1314 = vmatpush1.bf16.msra.mxu0 %v2610_v36  ;;  %1355 = vmatpush1.bf16.msra.mxu1 %v1943_v30  ;;  %v1782_v36 = vld [vmem:[%s2821_s6] sm:$0xff]  }
 0x665   :  { %1315 = vmatprep.subr.bf16.mxu0 %v2617_v37  ;;  %1356 = vmatprep.subr.bf16.mxu1 %v1944_v1  ;;  %v2859_v1 = vld [vmem:[#allocation11_spill] sm:$0xff] }
 0x668   :  { %1316 = vmatpush1.bf16.msra.mxu0 %v2624_v38  ;;  %1357 = vmatpush1.bf16.msra.mxu1 %v1945_v25 }
 0x669   :  { %1317 = vmatprep.subr.bf16.mxu0 %v2631_v39  ;;  %1358 = vmatprep.subr.bf16.mxu1 %v1946_v32  ;;  %v2854_v39 = vld [vmem:[#allocation8_spill] sm:$0xff]  ;;  %v2860_v32 = vld [vmem:[#allocation19_spill] sm:$0xff] }
 0x66c   :  { %1318 = vmatpush1.bf16.msra.mxu0 %v2638_v40  ;;  %1359 = vmatpush1.bf16.msra.mxu1 %v1947_v33 }
 0x66d   :  { %1319 = vmatprep.subr.bf16.mxu0 %v2645_v41  ;;  %1360 = vmatprep.subr.bf16.mxu1 %v1948_v34  ;;  %v2855_v41 = vld [vmem:[#allocation17_spill] sm:$0xff] }
 0x670   :  { %1320 = vmatpush1.bf16.msra.mxu0 %v2652_v42  ;;  %1361 = vmatpush1.bf16.msra.mxu1 %v1949_v35 }
 0x671   :  { %1693 = vmatprep.subr.bf16.mxu0 %v1782_v36 }
 0x726   :  { %v1227_v37 = vpop.f32.mrb[24].mxu0  ;;  %v1268_v38 = vpop.f32.mrb[56].mxu1 }
 0x727   :  { %v1228_v40 = vadd.f32 %v1227_v37, %v2854_v39  ;;  %v1269_v43 = vadd.f32 %v1268_v38, %v2855_v41  ;;  %v1229_v44 = vpop.f32.mrb[25].mxu0  ;;  %v1270_v10 = vpop.f32.mrb[57].mxu1 }
 0x728   :  { %v1230_v42 = vadd.f32 %v1229_v44, %v2856_v51  ;;  %v1271_v6 = vadd.f32 %v1270_v10, %v2857_v45  ;;  %v1231_v13 = vpop.f32.mrb[26].mxu0  ;;  %v1272_v14 = vpop.f32.mrb[58].mxu1  ;;  %v1665_v45 = vld [vmem:[%s2822_s7] ss:$0 sm:$0xff] }
 0x729   :  { %v1659_v15 = vmul.f32 -1.442695, %v1228_v40  ;;  %v1232_v16 = vpop.f32.mrb[27].mxu0  ;;  %v1273_v18 = vpop.f32.mrb[59].mxu1 }
 0x72a   :  { %v1660_v20 = vmul.f32 -1.442695, %v1230_v42  ;;  %v1661_v22 = vmul.f32 -1.442695, %v1271_v6 }
 0x72b   :  { %1886 = vpow2.f32 %v1659_v15 }
 0x72c   :  { %1888 = vpow2.f32 %v1660_v20 }
 0x72d   :  { %1890 = vpow2.f32 %v1661_v22 }
 0x72e   :  { %1892 = vtanh.f32 %v1269_v43 }
 0x735   :  { %v1887_v46 = vpop.eup %1886 }
 0x736   :  { %v1889_v23 = vpop.eup %1888  ;;  %v1278_v12 = vadd.f32 1.0, %v1887_v46 }
 0x737   :  { %v1284_v26 = vadd.f32 1.0, %v1889_v23  ;;  %v1891_v27 = vpop.eup %1890 }
 0x738   :  { %1894 = vrcp.f32 %v1278_v12  ;;  %v1893_v28 = vpop.eup %1892  ;;  %v1291_v59 = vadd.f32 1.0, %v1891_v27 }
 0x739   :  { %1896 = vrcp.f32 %v1284_v26 }
 0x73a   :  { %1898 = vrcp.f32 %v1291_v59 }
 0x742   :  { %v1895_v19 = vpop.eup %1894 }
 0x743   :  { %v1897_v57 = vpop.eup %1896  ;;  %v1295_v49 = vmul.f32 %v1895_v19, %v1893_v28 }
 0x744   :  { %v1294_v56 = vmul.f32 %v1897_v57, %v2665_v61  ;;  %v1899_v31 = vpop.eup %1898  ;;  %v1784_v61 = vld [vmem:[%s2821_s6 + $0x10] sm:$0xff]  }
 0x746   :  { %v2742_v62 = vadd.f32 %v1295_v49, %v1294_v56 }
 0x748   :  { %1900 = vtanh.f32 %v2742_v62 }
 0x752   :  { %v1901_v24 = vpop.eup %1900 }
 0x753   :  { %v2745_v0 = vmul.f32 %v1901_v24, %v1899_v31 }
 0x755   :  { %v1300_v53 = vpack.c.bf16 %v2745_v0, %v2745_v0 }
 0x757   :  { %1338 = vmatmul.mubr.bf16.vlgmr.msra.gmra.mrb[28].mxu0 %v1300_v53  ;;  %1379 = vmatmul.mubr.bf16.vlgmr.msra.gmra.mrb[60].mxu1 %v1300_v53 }
 0x758   :  { %1694 = vmatpush3.bf16.msra.mxu0 %v1782_v36  ;;  %1709 = vmatprep.mubr.bf16.mxu0 %v1420_v2 }
 0x759   :  { %1695 = vmatprep.subr.bf16.mxu0 %v1783_v9 }
 0x75c   :  { %1696 = vmatpush3.bf16.msra.mxu0 %v1783_v9 }
 0x75d   :  { %1697 = vmatprep.subr.bf16.mxu0 %v1784_v61 }
 0x760   :  { %1698 = vmatpush3.bf16.msra.mxu0 %v1784_v61 }
 0x761   :  { %1699 = vmatprep.subr.bf16.mxu0 %v1785_v60 }
 0x764   :  { %1700 = vmatpush3.bf16.msra.mxu0 %v1785_v60 }
 0x765   :  { %1701 = vmatprep.subr.bf16.mxu0 %v1786_v17 }
 0x768   :  { %1702 = vmatpush3.bf16.msra.mxu0 %v1786_v17 }
 0x769   :  { %1703 = vmatprep.subr.bf16.mxu0 %v1787_v21 }
 0x76c   :  { %1704 = vmatpush3.bf16.msra.mxu0 %v1787_v21 }
 0x76d   :  { %1705 = vmatprep.subr.bf16.mxu0 %v1788_v63 }
 0x770   :  { %1706 = vmatpush3.bf16.msra.mxu0 %v1788_v63 }
 0x771   :  { %1707 = vmatprep.subr.bf16.mxu0 %v1789_v55 }
 0x774   :  { %1708 = vmatpush3.bf16.msra.mxu0 %v1789_v55 }
 0x777   :  { %1710 = vmatmul.mubr.bf16.vlgmr.msra.gmra.mrb[32].mxu0 %v1421_v7 }
 0x778   :  { %1713 = vmatprep.mubr.bf16.mxu0 %v1422_v48 }
 0x82a   :  { %v1339_v8 = vpop.f32.mrb[28].mxu0  ;;  %v1380_v29 = vpop.f32.mrb[60].mxu1 }
 0x82b   :  { %v1340_v54 = vadd.f32 %v1339_v8, %v2858_v58  ;;  %v1381_v5 = vadd.f32 %v1380_v29, %v2346_v52  ;;  %v1341_v50 = vpop.f32.mrb[29].mxu0  ;;  %v1382_v30 = vpop.f32.mrb[61].mxu1 }
 0x82c   :  { %v1342_v25 = vadd.f32 %v1341_v50, %v2859_v1  ;;  %v1383_v33 = vadd.f32 %v1382_v30, %v2860_v32  ;;  %v1343_v34 = vpop.f32.mrb[30].mxu0  ;;  %v1384_v35 = vpop.f32.mrb[62].mxu1 }
 0x82d   :  { %v1662_v11 = vmul.f32 -1.442695, %v1340_v54  ;;  %v1344_v4 = vpop.f32.mrb[31].mxu0  ;;  %v1385_v36 = vpop.f32.mrb[63].mxu1 }
 0x82e   :  { %v1663_v47 = vmul.f32 -1.442695, %v1342_v25  ;;  %v1664_v3 = vmul.f32 -1.442695, %v1383_v33 }
 0x82f   :  { %1902 = vpow2.f32 %v1662_v11 }
 0x830   :  { %1904 = vpow2.f32 %v1663_v47 }
 0x831   :  { %1906 = vpow2.f32 %v1664_v3 }
 0x832   :  { %1908 = vtanh.f32 %v1381_v5 }
 0x839   :  { %v1903_v37 = vpop.eup %1902 }
 0x83a   :  { %v1905_v38 = vpop.eup %1904  ;;  %v1390_v39 = vadd.f32 1.0, %v1903_v37 }
 0x83b   :  { %v1396_v52 = vadd.f32 1.0, %v1905_v38  ;;  %v1907_v40 = vpop.eup %1906 }
 0x83c   :  { %1910 = vrcp.f32 %v1390_v39  ;;  %v1909_v41 = vpop.eup %1908  ;;  %v1403_v51 = vadd.f32 1.0, %v1907_v40 }
 0x83d   :  { %1912 = vrcp.f32 %v1396_v52 }
 0x83e   :  { %1914 = vrcp.f32 %v1403_v51 }
 0x846   :  { %v1911_v43 = vpop.eup %1910 }
 0x847   :  { %v1913_v44 = vpop.eup %1912  ;;  %v1407_v10 = vmul.f32 %v1911_v43, %v1909_v41 }
 0x848   :  { %v1406_v42 = vmul.f32 %v1913_v44, %v2742_v62  ;;  %v1915_v23 = vpop.eup %1914 }
 0x84a   :  { %v1408_v6 = vadd.f32 %v1407_v10, %v1406_v42  ;;  %v1711_v13 = vpop.f32.mrb[32].mxu0 }
 0x84b   :  { %v1538_v14 = vadd.f32 %v1711_v13, %v1665_v45  ;;  %v1529_v15 = vpop.f32.mrb[33].mxu0 }
 0x84c   :  { %1576 = vst [vmem:[%s2823_s10] sm:$0xff] %v1408_v6  ;;  %v1530_v16 = vadd.f32 %v1665_v45, %v1529_v15  ;;  %v1712_v18 = vpop.f32.mrb[34].mxu0  ;;  %1916 = vtanh.f32 %v1408_v6 }
 0x84d   :  { %1675 = vst [vmem:[%s2824_s8 + $0x10] sm:$0xff] %v1538_v14  ;;  %v1541_v20 = vadd.f32 %v1712_v18, %v1665_v45  ;;  %v1532_v22 = vpop.f32.mrb[35].mxu0 }
 0x84e   :  { %1560 = vst [vmem:[%s2824_s8] sm:$0xff] %v1530_v16  ;;  %v1533_v46 = vadd.f32 %v1665_v45, %v1532_v22 }
 0x84f   :  { %1676 = vst [vmem:[%s2824_s8 + $0x18] sm:$0xff] %v1541_v20 }
 0x850   :  { %1674 = vst [vmem:[%s2824_s8 + $0x8] sm:$0xff] %v1533_v46 }
 0x856   :  { %v1917_v12 = vpop.eup %1916 }
 0x857   :  { %v1410_v26 = vmul.f32 %v1917_v12, %v1915_v23 }
 0x859   :  { %v1423_v27 = vpack.c.bf16 %v1410_v26, %v2745_v0  ;;  %1575 = vst [vmem:[%s2825_s9] sm:$0xff] %v1410_v26 }
 0x85b   :  { %1714 = vmatmul.mubr.bf16.gmra.mrb[36].mxu0 %v1423_v27 }
 0x92e   :  { %v1715_v28 = vpop.f32.mrb[36].mxu0 }
 0x92f   :  { %v1554_v19 = vadd.f32 %v1715_v28, %v1665_v45  ;;  %v1545_v57 = vpop.f32.mrb[37].mxu0 }
 0x930   :  { %v1546_v49 = vadd.f32 %v1665_v45, %v1545_v57  ;;  %v1716_v59 = vpop.f32.mrb[38].mxu0 }
 0x931   :  { %1679 = vst [vmem:[%s2824_s8 + $0x30] sm:$0xff] %v1554_v19  ;;  %v1557_v56 = vadd.f32 %v1716_v59, %v1665_v45  ;;  %v1548_v62 = vpop.f32.mrb[39].mxu0 }
 0x932   :  { %1677 = vst [vmem:[%s2824_s8 + $0x20] sm:$0xff] %v1546_v49  ;;  %v1549_v31 = vadd.f32 %v1665_v45, %v1548_v62 }
 0x933   :  { %1680 = vst [vmem:[%s2824_s8 + $0x38] sm:$0xff] %v1557_v56 }
 0x934   :  { %1678 = vst [vmem:[%s2824_s8 + $0x28] sm:$0xff] %v1549_v31 }

</bundles_post_ra>
